<compile_context>
chip_gen: v7x
topology: tpu7x:2x2x1
jax: 0.10.0
libtpu: 0.0.40
codegen_flags: <defaults>
</compile_context>

<pallas_src>
import functools

import jax
import jax.numpy as jnp
from jax import lax
from jax.experimental import pallas as pl
from jax.experimental.pallas import tpu as pltpu  # noqa: F401  (TPU backend)


def _layer_norm(x, w, b, eps=1e-5):
    mu = jnp.mean(x, axis=-1, keepdims=True)
    xc = x - mu
    var = jnp.mean(xc * xc, axis=-1, keepdims=True)
    return xc * lax.rsqrt(var + eps) * w + b


def _transformer_kernel(x_ref, emb_w_ref, emb_b_ref, pe_ref,
                        wqkv_ref, bqkv_ref, wo_ref, bo_ref,
                        w1_ref, b1_ref, w2_ref, b2_ref,
                        ln1w_ref, ln1b_ref, ln2w_ref, ln2b_ref,
                        o_ref, *, num_heads, num_layers, batch, seq):
    f32 = jnp.float32
    NL, H = o_ref.shape
    nh = num_heads
    hd = H // nh
    N, L = batch, seq
    scale = 1.0 / (hd ** 0.5)

    # Embedding + positional encoding (rows are batch-major: row = n*L + l).
    h = jnp.dot(x_ref[...], emb_w_ref[...], preferred_element_type=f32)
    h = h + emb_b_ref[...] + pe_ref[...]

    for l in range(num_layers):          # static unroll; weights stay resident
        # ---- fused QKV: one lane-dense (NL, H) @ (H, 3H) MXU call ----
        qkv = jnp.dot(h, wqkv_ref[l], preferred_element_type=f32) + bqkv_ref[l]
        q = (qkv[:, :H] * scale).reshape(N, L, H)
        k = qkv[:, H:2 * H].reshape(N, L, H)
        v = qkv[:, 2 * H:].reshape(N, L, H)

        # ---- attention core: heads unrolled, batched over N per head.
        # Output projection folded in per head via linearity (avoids any
        # lane concatenate for head re-assembly).
        wo = wo_ref[l]                                           # (H, H)
        attn = jnp.zeros((NL, H), f32)
        for hh in range(nh):
            cols = slice(hh * hd, (hh + 1) * hd)
            qh = q[:, :, cols]                                   # (N, L, hd)
            kh = k[:, :, cols]
            vh = v[:, :, cols]
            s = lax.dot_general(qh, kh, (((2,), (2,)), ((0,), (0,))),
                                preferred_element_type=f32)      # (N, L, L)
            s = s - jnp.max(s, axis=-1, keepdims=True)
            p = jnp.exp(s)
            p = p * pl.reciprocal(jnp.sum(p, axis=-1, keepdims=True),
                                  approx=True)
            oh = lax.dot_general(p, vh, (((2,), (1,)), ((0,), (0,))),
                                 preferred_element_type=f32)     # (N, L, hd)
            attn = attn + jnp.dot(oh.reshape(NL, hd), wo[cols, :],
                                  preferred_element_type=f32)    # (NL, H)
        attn = attn + bo_ref[l]

        # residual + LayerNorm 1 (post-norm, PyTorch default norm_first=False)
        h = _layer_norm(h + attn, ln1w_ref[l], ln1b_ref[l])

        # ---- feed-forward (relu) on the full (NL, .) row block ----
        ff = jnp.dot(h, w1_ref[l], preferred_element_type=f32) + b1_ref[l]
        ff = jnp.maximum(ff, 0.0)
        ff = jnp.dot(ff, w2_ref[l], preferred_element_type=f32) + b2_ref[l]

        # residual + LayerNorm 2
        h = _layer_norm(h + ff, ln2w_ref[l], ln2b_ref[l])

    o_ref[...] = h


@functools.partial(jax.jit, static_argnames=("num_heads", "num_layers"))
def custom_transformer_forward(x_lnd, params, *, num_heads, num_layers):
    """x_lnd: (L, N, input_dim) float32 -> (L, N, hidsize) float32."""
    L, N, Din = x_lnd.shape
    H = params["emb_w"].shape[0]
    NL = N * L
    Din_pad = ((Din + 127) // 128) * 128

    # Batch-major rows: row n*L + l  <-  x[l, n, :].  Zero-pad feature dim to
    # a 128-lane slab for dense loads (padded weight rows below are zero).
    x_rows = jnp.transpose(x_lnd, (1, 0, 2)).reshape(NL, Din)
    x_rows = jnp.pad(x_rows, ((0, 0), (0, Din_pad - Din)))

    emb_wT = jnp.pad(params["emb_w"].T, ((0, Din_pad - Din), (0, 0)))  # (Din_pad, H)
    emb_b = params["emb_b"][None, :]                                   # (1, H)
    # The module adds positional_encoding[:, :x.size(1), :]; with seq-first
    # input x.size(1) == N (the batch dim).  Reproduced intentionally.
    pe_rows = jnp.repeat(params["pe"][0, :N, :], L, axis=0)            # (NL, H)

    # Lane-dense weight layouts (largest dim last): x @ W conventions.
    wqkv = params["in_proj_w"].transpose(0, 2, 1)      # (layers, H, 3H)
    bqkv = params["in_proj_b"][:, None, :]             # (layers, 1, 3H)
    wo = params["out_proj_w"].transpose(0, 2, 1)       # (layers, H, H)
    bo = params["out_proj_b"][:, None, :]              # (layers, 1, H)
    w1 = params["lin1_w"].transpose(0, 2, 1)           # (layers, H, 4H)
    b1 = params["lin1_b"][:, None, :]                  # (layers, 1, 4H)
    w2 = params["lin2_w"].transpose(0, 2, 1)           # (layers, 4H, H)
    b2 = params["lin2_b"][:, None, :]                  # (layers, 1, H)
    ln1w = params["ln1_w"][:, None, :]
    ln1b = params["ln1_b"][:, None, :]
    ln2w = params["ln2_w"][:, None, :]
    ln2b = params["ln2_b"][:, None, :]

    args = (x_rows, emb_wT, emb_b, pe_rows,
            wqkv, bqkv, wo, bo, w1, b1, w2, b2, ln1w, ln1b, ln2w, ln2b)

    kernel = functools.partial(_transformer_kernel, num_heads=num_heads,
                               num_layers=num_layers, batch=N, seq=L)

    # No grid: everything (weights + activations, ~150 KB) is VMEM-resident;
    # the kernel runs once over the full row block.
    out_rows = pl.pallas_call(
        kernel,
        out_shape=jax.ShapeDtypeStruct((NL, H), jnp.float32),
    )(*args)
    return out_rows.reshape(N, L, H).transpose(1, 0, 2)      # back to (L, N, H)


def init_params(key, input_dim, hidsize, num_heads, num_layers, memory_size):
    """Deterministic synthetic parameters in PyTorch layout (weight = (out, in))."""
    H = hidsize
    ks = jax.random.split(key, 11)

    def nrm(k, shape, scale):
        return (scale * jax.random.normal(k, shape)).astype(jnp.float32)

    return {
        "emb_w": nrm(ks[0], (H, input_dim), 1.0 / (input_dim ** 0.5)),
        "emb_b": nrm(ks[1], (H,), 0.02),
        "pe": nrm(ks[2], (1, memory_size, H), 1.0),                      # torch.randn
        "in_proj_w": nrm(ks[3], (num_layers, 3 * H, H), 1.0 / (H ** 0.5)),
        "in_proj_b": nrm(ks[4], (num_layers, 3 * H), 0.02),
        "out_proj_w": nrm(ks[5], (num_layers, H, H), 1.0 / (H ** 0.5)),
        "out_proj_b": nrm(ks[6], (num_layers, H), 0.02),
        "lin1_w": nrm(ks[7], (num_layers, 4 * H, H), 1.0 / (H ** 0.5)),
        "lin1_b": nrm(ks[8], (num_layers, 4 * H), 0.02),
        "lin2_w": nrm(ks[9], (num_layers, H, 4 * H), 1.0 / ((4 * H) ** 0.5)),
        "lin2_b": nrm(ks[10], (num_layers, H), 0.02),
        "ln1_w": jnp.ones((num_layers, H), jnp.float32),
        "ln1_b": jnp.zeros((num_layers, H), jnp.float32),
        "ln2_w": jnp.ones((num_layers, H), jnp.float32),
        "ln2_b": jnp.zeros((num_layers, H), jnp.float32),
    }


def reference_forward(x_lnd, params, *, num_heads, num_layers):
    """Pure-JAX reference of the module's forward semantics, for validation."""
    H = params["emb_w"].shape[0]
    nh = num_heads
    hd = H // nh
    L, N, _ = x_lnd.shape
    scale = 1.0 / (hd ** 0.5)

    h = jnp.einsum("lnd,hd->lnh", x_lnd, params["emb_w"]) + params["emb_b"]
    h = h + params["pe"][:, :N, :]            # (1, N, H) broadcast over L (as in module)
    for l in range(num_layers):
        qkv = (jnp.einsum("lnh,kh->lnk", h, params["in_proj_w"][l])
               + params["in_proj_b"][l])
        q, k, v = jnp.split(qkv, 3, axis=-1)
        q = q.reshape(L, N, nh, hd) * scale
        k = k.reshape(L, N, nh, hd)
        v = v.reshape(L, N, nh, hd)
        s = jnp.einsum("lnhd,mnhd->nhlm", q, k)
        p = jax.nn.softmax(s, axis=-1)
        a = jnp.einsum("nhlm,mnhd->lnhd", p, v).reshape(L, N, H)
        a = (jnp.einsum("lnh,kh->lnk", a, params["out_proj_w"][l])
             + params["out_proj_b"][l])
        h = _layer_norm(h + a, params["ln1_w"][l], params["ln1_b"][l])
        ff = (jnp.einsum("lnh,kh->lnk", h, params["lin1_w"][l])
              + params["lin1_b"][l])
        ff = jnp.maximum(ff, 0.0)
        ff = (jnp.einsum("lnk,hk->lnh", ff, params["lin2_w"][l])
              + params["lin2_b"][l])
        h = _layer_norm(h + ff, params["ln2_w"][l], params["ln2_b"][l])
    return h


if __name__ == "__main__":
    # Small shapes consistent with the module's forward.
    input_dim, hidsize, num_heads, num_layers, memory_size = 16, 32, 4, 2, 16
    L, N = 8, 2   # seq length, batch

    key = jax.random.PRNGKey(0)
    kx, kp = jax.random.split(key)
    x = jax.random.normal(kx, (L, N, input_dim), dtype=jnp.float32)
    params = init_params(kp, input_dim, hidsize, num_heads, num_layers, memory_size)

    out = custom_transformer_forward(x, params, num_heads=num_heads,
                                     num_layers=num_layers)
    out = jax.block_until_ready(out)
    assert out.shape == (L, N, hidsize), out.shape

    ref = reference_forward(x, params, num_heads=num_heads, num_layers=num_layers)
    max_err = float(jnp.max(jnp.abs(out - ref)))
    assert max_err < 1e-2, f"max abs err too large: {max_err}"

    print("KERNEL_OK")
</pallas_src>

<mosaic_0001>
module attributes {stable_mosaic.version = 11 : i64} {
  func.func @_transformer_kernel(%arg0: memref<16x128xf32, #tpu.memory_space<vmem>>, %arg1: memref<128x32xf32, #tpu.memory_space<vmem>>, %arg2: memref<1x32xf32, #tpu.memory_space<vmem>>, %arg3: memref<16x32xf32, #tpu.memory_space<vmem>>, %arg4: memref<2x32x96xf32, #tpu.memory_space<vmem>>, %arg5: memref<2x1x96xf32, #tpu.memory_space<vmem>>, %arg6: memref<2x32x32xf32, #tpu.memory_space<vmem>>, %arg7: memref<2x1x32xf32, #tpu.memory_space<vmem>>, %arg8: memref<2x32x128xf32, #tpu.memory_space<vmem>>, %arg9: memref<2x1x128xf32, #tpu.memory_space<vmem>>, %arg10: memref<2x128x32xf32, #tpu.memory_space<vmem>>, %arg11: memref<2x1x32xf32, #tpu.memory_space<vmem>>, %arg12: memref<2x1x32xf32, #tpu.memory_space<vmem>>, %arg13: memref<2x1x32xf32, #tpu.memory_space<vmem>>, %arg14: memref<2x1x32xf32, #tpu.memory_space<vmem>>, %arg15: memref<2x1x32xf32, #tpu.memory_space<vmem>>, %arg16: memref<16x32xf32, #tpu.memory_space<vmem>>) attributes {dimension_semantics = [], scalar_prefetch = 0 : i64, scratch_operands = 0 : i64, tpu.core_type = #tpu.core_type<tc>} {
    %c0 = arith.constant 0 : index
    %c0_0 = arith.constant 0 : index
    %0 = vector.load %arg0[%c0, %c0_0] : memref<16x128xf32, #tpu.memory_space<vmem>>, vector<16x128xf32>
    %c0_1 = arith.constant 0 : index
    %c0_2 = arith.constant 0 : index
    %1 = vector.load %arg1[%c0_1, %c0_2] : memref<128x32xf32, #tpu.memory_space<vmem>>, vector<128x32xf32>
    %cst = arith.constant dense<0.000000e+00> : vector<16x32xf32>
    %2 = tpu.matmul %0, %1, %cst {dimension_numbers = #tpu.dot_dimension_numbers<[1], [0], [0], [1], [0, 0, 1, 1], [], []>} : vector<16x128xf32>, vector<128x32xf32>, vector<16x32xf32> -> vector<16x32xf32>
    %c0_3 = arith.constant 0 : index
    %c0_4 = arith.constant 0 : index
    %3 = vector.load %arg2[%c0_3, %c0_4] : memref<1x32xf32, #tpu.memory_space<vmem>>, vector<1x32xf32>
    %4 = vector.broadcast %3 : vector<1x32xf32> to vector<16x32xf32>
    %5 = arith.addf %2, %4 : vector<16x32xf32>
    %c0_5 = arith.constant 0 : index
    %c0_6 = arith.constant 0 : index
    %6 = vector.load %arg3[%c0_5, %c0_6] : memref<16x32xf32, #tpu.memory_space<vmem>>, vector<16x32xf32>
    %7 = arith.addf %5, %6 : vector<16x32xf32>
    %c0_7 = arith.constant 0 : index
    %c0_8 = arith.constant 0 : index
    %c0_9 = arith.constant 0 : index
    %8 = vector.load %arg4[%c0_7, %c0_8, %c0_9] : memref<2x32x96xf32, #tpu.memory_space<vmem>>, vector<1x32x96xf32>
    %9 = vector.shape_cast %8 : vector<1x32x96xf32> to vector<32x96xf32>
    %cst_10 = arith.constant dense<0.000000e+00> : vector<16x96xf32>
    %10 = tpu.matmul %7, %9, %cst_10 {dimension_numbers = #tpu.dot_dimension_numbers<[1], [0], [0], [1], [0, 0, 1, 1], [], []>} : vector<16x32xf32>, vector<32x96xf32>, vector<16x96xf32> -> vector<16x96xf32>
    %c0_11 = arith.constant 0 : index
    %c0_12 = arith.constant 0 : index
    %c0_13 = arith.constant 0 : index
    %11 = vector.load %arg5[%c0_11, %c0_12, %c0_13] : memref<2x1x96xf32, #tpu.memory_space<vmem>>, vector<1x1x96xf32>
    %12 = vector.shape_cast %11 : vector<1x1x96xf32> to vector<1x96xf32>
    %13 = vector.broadcast %12 : vector<1x96xf32> to vector<16x96xf32>
    %14 = arith.addf %10, %13 : vector<16x96xf32>
    %15 = vector.extract_strided_slice %14 {offsets = [0, 0], sizes = [16, 32], strides = [1, 1]} : vector<16x96xf32> to vector<16x32xf32>
    %cst_14 = arith.constant 0.353553385 : f32
    %16 = vector.broadcast %cst_14 : f32 to vector<16x32xf32>
    %17 = arith.mulf %15, %16 : vector<16x32xf32>
    %18 = vector.shape_cast %17 : vector<16x32xf32> to vector<2x8x32xf32>
    %19 = vector.extract_strided_slice %14 {offsets = [0, 32], sizes = [16, 32], strides = [1, 1]} : vector<16x96xf32> to vector<16x32xf32>
    %20 = vector.shape_cast %19 : vector<16x32xf32> to vector<2x8x32xf32>
    %21 = vector.extract_strided_slice %14 {offsets = [0, 64], sizes = [16, 32], strides = [1, 1]} : vector<16x96xf32> to vector<16x32xf32>
    %22 = vector.shape_cast %21 : vector<16x32xf32> to vector<2x8x32xf32>
    %c0_15 = arith.constant 0 : index
    %c0_16 = arith.constant 0 : index
    %c0_17 = arith.constant 0 : index
    %23 = vector.load %arg6[%c0_15, %c0_16, %c0_17] : memref<2x32x32xf32, #tpu.memory_space<vmem>>, vector<1x32x32xf32>
    %24 = vector.shape_cast %23 : vector<1x32x32xf32> to vector<32x32xf32>
    %cst_18 = arith.constant 0.000000e+00 : f32
    %25 = vector.broadcast %cst_18 : f32 to vector<16x32xf32>
    %26 = vector.extract_strided_slice %18 {offsets = [0, 0, 0], sizes = [2, 8, 8], strides = [1, 1, 1]} : vector<2x8x32xf32> to vector<2x8x8xf32>
    %27 = vector.extract_strided_slice %20 {offsets = [0, 0, 0], sizes = [2, 8, 8], strides = [1, 1, 1]} : vector<2x8x32xf32> to vector<2x8x8xf32>
    %28 = vector.extract_strided_slice %22 {offsets = [0, 0, 0], sizes = [2, 8, 8], strides = [1, 1, 1]} : vector<2x8x32xf32> to vector<2x8x8xf32>
    %cst_19 = arith.constant dense<0.000000e+00> : vector<2x8x8xf32>
    %29 = tpu.matmul %26, %27, %cst_19 {dimension_numbers = #tpu.dot_dimension_numbers<[2], [2], [1], [1], [0, 0, 0, 1, 1, 1], [0], [0]>} : vector<2x8x8xf32>, vector<2x8x8xf32>, vector<2x8x8xf32> -> vector<2x8x8xf32>
    %cst_20 = arith.constant dense<0xFF800000> : vector<2x8xf32>
    %30 = vector.multi_reduction <maximumf>, %29, %cst_20 [2] : vector<2x8x8xf32> to vector<2x8xf32>
    %31 = vector.shape_cast %30 : vector<2x8xf32> to vector<2x8x1xf32>
    %32 = vector.broadcast %31 : vector<2x8x1xf32> to vector<2x8x8xf32>
    %33 = arith.subf %29, %32 : vector<2x8x8xf32>
    %34 = math.exp %33 : vector<2x8x8xf32>
    %cst_21 = arith.constant dense<0.000000e+00> : vector<2x8xf32>
    %35 = vector.multi_reduction <add>, %34, %cst_21 [2] : vector<2x8x8xf32> to vector<2x8xf32>
    %36 = vector.shape_cast %35 : vector<2x8xf32> to vector<2x8x1xf32>
    %37 = tpu.reciprocal %36 {approx = true} : vector<2x8x1xf32> -> vector<2x8x1xf32>
    %38 = vector.broadcast %37 : vector<2x8x1xf32> to vector<2x8x8xf32>
    %39 = arith.mulf %34, %38 : vector<2x8x8xf32>
    %cst_22 = arith.constant dense<0.000000e+00> : vector<2x8x8xf32>
    %40 = tpu.matmul %39, %28, %cst_22 {dimension_numbers = #tpu.dot_dimension_numbers<[2], [1], [1], [2], [0, 0, 0, 1, 1, 2], [0], [0]>} : vector<2x8x8xf32>, vector<2x8x8xf32>, vector<2x8x8xf32> -> vector<2x8x8xf32>
    %41 = vector.shape_cast %40 : vector<2x8x8xf32> to vector<16x8xf32>
    %42 = vector.extract_strided_slice %24 {offsets = [0, 0], sizes = [8, 32], strides = [1, 1]} : vector<32x32xf32> to vector<8x32xf32>
    %cst_23 = arith.constant dense<0.000000e+00> : vector<16x32xf32>
    %43 = tpu.matmul %41, %42, %cst_23 {dimension_numbers = #tpu.dot_dimension_numbers<[1], [0], [0], [1], [0, 0, 1, 1], [], []>} : vector<16x8xf32>, vector<8x32xf32>, vector<16x32xf32> -> vector<16x32xf32>
    %44 = arith.addf %25, %43 : vector<16x32xf32>
    %45 = vector.extract_strided_slice %18 {offsets = [0, 0, 8], sizes = [2, 8, 8], strides = [1, 1, 1]} : vector<2x8x32xf32> to vector<2x8x8xf32>
    %46 = vector.extract_strided_slice %20 {offsets = [0, 0, 8], sizes = [2, 8, 8], strides = [1, 1, 1]} : vector<2x8x32xf32> to vector<2x8x8xf32>
    %47 = vector.extract_strided_slice %22 {offsets = [0, 0, 8], sizes = [2, 8, 8], strides = [1, 1, 1]} : vector<2x8x32xf32> to vector<2x8x8xf32>
    %cst_24 = arith.constant dense<0.000000e+00> : vector<2x8x8xf32>
    %48 = tpu.matmul %45, %46, %cst_24 {dimension_numbers = #tpu.dot_dimension_numbers<[2], [2], [1], [1], [0, 0, 0, 1, 1, 1], [0], [0]>} : vector<2x8x8xf32>, vector<2x8x8xf32>, vector<2x8x8xf32> -> vector<2x8x8xf32>
    %cst_25 = arith.constant dense<0xFF800000> : vector<2x8xf32>
    %49 = vector.multi_reduction <maximumf>, %48, %cst_25 [2] : vector<2x8x8xf32> to vector<2x8xf32>
    %50 = vector.shape_cast %49 : vector<2x8xf32> to vector<2x8x1xf32>
    %51 = vector.broadcast %50 : vector<2x8x1xf32> to vector<2x8x8xf32>
    %52 = arith.subf %48, %51 : vector<2x8x8xf32>
    %53 = math.exp %52 : vector<2x8x8xf32>
    %cst_26 = arith.constant dense<0.000000e+00> : vector<2x8xf32>
    %54 = vector.multi_reduction <add>, %53, %cst_26 [2] : vector<2x8x8xf32> to vector<2x8xf32>
    %55 = vector.shape_cast %54 : vector<2x8xf32> to vector<2x8x1xf32>
    %56 = tpu.reciprocal %55 {approx = true} : vector<2x8x1xf32> -> vector<2x8x1xf32>
    %57 = vector.broadcast %56 : vector<2x8x1xf32> to vector<2x8x8xf32>
    %58 = arith.mulf %53, %57 : vector<2x8x8xf32>
    %cst_27 = arith.constant dense<0.000000e+00> : vector<2x8x8xf32>
    %59 = tpu.matmul %58, %47, %cst_27 {dimension_numbers = #tpu.dot_dimension_numbers<[2], [1], [1], [2], [0, 0, 0, 1, 1, 2], [0], [0]>} : vector<2x8x8xf32>, vector<2x8x8xf32>, vector<2x8x8xf32> -> vector<2x8x8xf32>
    %60 = vector.shape_cast %59 : vector<2x8x8xf32> to vector<16x8xf32>
    %61 = vector.extract_strided_slice %24 {offsets = [8, 0], sizes = [8, 32], strides = [1, 1]} : vector<32x32xf32> to vector<8x32xf32>
    %cst_28 = arith.constant dense<0.000000e+00> : vector<16x32xf32>
    %62 = tpu.matmul %60, %61, %cst_28 {dimension_numbers = #tpu.dot_dimension_numbers<[1], [0], [0], [1], [0, 0, 1, 1], [], []>} : vector<16x8xf32>, vector<8x32xf32>, vector<16x32xf32> -> vector<16x32xf32>
    %63 = arith.addf %44, %62 : vector<16x32xf32>
    %64 = vector.extract_strided_slice %18 {offsets = [0, 0, 16], sizes = [2, 8, 8], strides = [1, 1, 1]} : vector<2x8x32xf32> to vector<2x8x8xf32>
    %65 = vector.extract_strided_slice %20 {offsets = [0, 0, 16], sizes = [2, 8, 8], strides = [1, 1, 1]} : vector<2x8x32xf32> to vector<2x8x8xf32>
    %66 = vector.extract_strided_slice %22 {offsets = [0, 0, 16], sizes = [2, 8, 8], strides = [1, 1, 1]} : vector<2x8x32xf32> to vector<2x8x8xf32>
    %cst_29 = arith.constant dense<0.000000e+00> : vector<2x8x8xf32>
    %67 = tpu.matmul %64, %65, %cst_29 {dimension_numbers = #tpu.dot_dimension_numbers<[2], [2], [1], [1], [0, 0, 0, 1, 1, 1], [0], [0]>} : vector<2x8x8xf32>, vector<2x8x8xf32>, vector<2x8x8xf32> -> vector<2x8x8xf32>
    %cst_30 = arith.constant dense<0xFF800000> : vector<2x8xf32>
    %68 = vector.multi_reduction <maximumf>, %67, %cst_30 [2] : vector<2x8x8xf32> to vector<2x8xf32>
    %69 = vector.shape_cast %68 : vector<2x8xf32> to vector<2x8x1xf32>
    %70 = vector.broadcast %69 : vector<2x8x1xf32> to vector<2x8x8xf32>
    %71 = arith.subf %67, %70 : vector<2x8x8xf32>
    %72 = math.exp %71 : vector<2x8x8xf32>
    %cst_31 = arith.constant dense<0.000000e+00> : vector<2x8xf32>
    %73 = vector.multi_reduction <add>, %72, %cst_31 [2] : vector<2x8x8xf32> to vector<2x8xf32>
    %74 = vector.shape_cast %73 : vector<2x8xf32> to vector<2x8x1xf32>
    %75 = tpu.reciprocal %74 {approx = true} : vector<2x8x1xf32> -> vector<2x8x1xf32>
    %76 = vector.broadcast %75 : vector<2x8x1xf32> to vector<2x8x8xf32>
    %77 = arith.mulf %72, %76 : vector<2x8x8xf32>
    %cst_32 = arith.constant dense<0.000000e+00> : vector<2x8x8xf32>
    %78 = tpu.matmul %77, %66, %cst_32 {dimension_numbers = #tpu.dot_dimension_numbers<[2], [1], [1], [2], [0, 0, 0, 1, 1, 2], [0], [0]>} : vector<2x8x8xf32>, vector<2x8x8xf32>, vector<2x8x8xf32> -> vector<2x8x8xf32>
    %79 = vector.shape_cast %78 : vector<2x8x8xf32> to vector<16x8xf32>
    %80 = vector.extract_strided_slice %24 {offsets = [16, 0], sizes = [8, 32], strides = [1, 1]} : vector<32x32xf32> to vector<8x32xf32>
    %cst_33 = arith.constant dense<0.000000e+00> : vector<16x32xf32>
    %81 = tpu.matmul %79, %80, %cst_33 {dimension_numbers = #tpu.dot_dimension_numbers<[1], [0], [0], [1], [0, 0, 1, 1], [], []>} : vector<16x8xf32>, vector<8x32xf32>, vector<16x32xf32> -> vector<16x32xf32>
    %82 = arith.addf %63, %81 : vector<16x32xf32>
    %83 = vector.extract_strided_slice %18 {offsets = [0, 0, 24], sizes = [2, 8, 8], strides = [1, 1, 1]} : vector<2x8x32xf32> to vector<2x8x8xf32>
    %84 = vector.extract_strided_slice %20 {offsets = [0, 0, 24], sizes = [2, 8, 8], strides = [1, 1, 1]} : vector<2x8x32xf32> to vector<2x8x8xf32>
    %85 = vector.extract_strided_slice %22 {offsets = [0, 0, 24], sizes = [2, 8, 8], strides = [1, 1, 1]} : vector<2x8x32xf32> to vector<2x8x8xf32>
    %cst_34 = arith.constant dense<0.000000e+00> : vector<2x8x8xf32>
    %86 = tpu.matmul %83, %84, %cst_34 {dimension_numbers = #tpu.dot_dimension_numbers<[2], [2], [1], [1], [0, 0, 0, 1, 1, 1], [0], [0]>} : vector<2x8x8xf32>, vector<2x8x8xf32>, vector<2x8x8xf32> -> vector<2x8x8xf32>
    %cst_35 = arith.constant dense<0xFF800000> : vector<2x8xf32>
    %87 = vector.multi_reduction <maximumf>, %86, %cst_35 [2] : vector<2x8x8xf32> to vector<2x8xf32>
    %88 = vector.shape_cast %87 : vector<2x8xf32> to vector<2x8x1xf32>
    %89 = vector.broadcast %88 : vector<2x8x1xf32> to vector<2x8x8xf32>
    %90 = arith.subf %86, %89 : vector<2x8x8xf32>
    %91 = math.exp %90 : vector<2x8x8xf32>
    %cst_36 = arith.constant dense<0.000000e+00> : vector<2x8xf32>
    %92 = vector.multi_reduction <add>, %91, %cst_36 [2] : vector<2x8x8xf32> to vector<2x8xf32>
    %93 = vector.shape_cast %92 : vector<2x8xf32> to vector<2x8x1xf32>
    %94 = tpu.reciprocal %93 {approx = true} : vector<2x8x1xf32> -> vector<2x8x1xf32>
    %95 = vector.broadcast %94 : vector<2x8x1xf32> to vector<2x8x8xf32>
    %96 = arith.mulf %91, %95 : vector<2x8x8xf32>
    %cst_37 = arith.constant dense<0.000000e+00> : vector<2x8x8xf32>
    %97 = tpu.matmul %96, %85, %cst_37 {dimension_numbers = #tpu.dot_dimension_numbers<[2], [1], [1], [2], [0, 0, 0, 1, 1, 2], [0], [0]>} : vector<2x8x8xf32>, vector<2x8x8xf32>, vector<2x8x8xf32> -> vector<2x8x8xf32>
    %98 = vector.shape_cast %97 : vector<2x8x8xf32> to vector<16x8xf32>
    %99 = vector.extract_strided_slice %24 {offsets = [24, 0], sizes = [8, 32], strides = [1, 1]} : vector<32x32xf32> to vector<8x32xf32>
    %cst_38 = arith.constant dense<0.000000e+00> : vector<16x32xf32>
    %100 = tpu.matmul %98, %99, %cst_38 {dimension_numbers = #tpu.dot_dimension_numbers<[1], [0], [0], [1], [0, 0, 1, 1], [], []>} : vector<16x8xf32>, vector<8x32xf32>, vector<16x32xf32> -> vector<16x32xf32>
    %101 = arith.addf %82, %100 : vector<16x32xf32>
    %c0_39 = arith.constant 0 : index
    %c0_40 = arith.constant 0 : index
    %c0_41 = arith.constant 0 : index
    %102 = vector.load %arg7[%c0_39, %c0_40, %c0_41] : memref<2x1x32xf32, #tpu.memory_space<vmem>>, vector<1x1x32xf32>
    %103 = vector.shape_cast %102 : vector<1x1x32xf32> to vector<1x32xf32>
    %104 = vector.broadcast %103 : vector<1x32xf32> to vector<16x32xf32>
    %105 = arith.addf %101, %104 : vector<16x32xf32>
    %106 = arith.addf %7, %105 : vector<16x32xf32>
    %c0_42 = arith.constant 0 : index
    %c0_43 = arith.constant 0 : index
    %c0_44 = arith.constant 0 : index
    %107 = vector.load %arg12[%c0_42, %c0_43, %c0_44] : memref<2x1x32xf32, #tpu.memory_space<vmem>>, vector<1x1x32xf32>
    %108 = vector.shape_cast %107 : vector<1x1x32xf32> to vector<1x32xf32>
    %c0_45 = arith.constant 0 : index
    %c0_46 = arith.constant 0 : index
    %c0_47 = arith.constant 0 : index
    %109 = vector.load %arg13[%c0_45, %c0_46, %c0_47] : memref<2x1x32xf32, #tpu.memory_space<vmem>>, vector<1x1x32xf32>
    %110 = vector.shape_cast %109 : vector<1x1x32xf32> to vector<1x32xf32>
    %cst_48 = arith.constant dense<0.000000e+00> : vector<16xf32>
    %111 = vector.multi_reduction <add>, %106, %cst_48 [1] : vector<16x32xf32> to vector<16xf32>
    %112 = vector.shape_cast %111 : vector<16xf32> to vector<16x1xf32>
    %cst_49 = arith.constant 3.200000e+01 : f32
    %113 = vector.broadcast %cst_49 : f32 to vector<16x1xf32>
    %114 = arith.divf %112, %113 : vector<16x1xf32>
    %115 = vector.broadcast %114 : vector<16x1xf32> to vector<16x32xf32>
    %116 = arith.subf %106, %115 : vector<16x32xf32>
    %117 = arith.mulf %116, %116 : vector<16x32xf32>
    %cst_50 = arith.constant dense<0.000000e+00> : vector<16xf32>
    %118 = vector.multi_reduction <add>, %117, %cst_50 [1] : vector<16x32xf32> to vector<16xf32>
    %119 = vector.shape_cast %118 : vector<16xf32> to vector<16x1xf32>
    %cst_51 = arith.constant 3.200000e+01 : f32
    %120 = vector.broadcast %cst_51 : f32 to vector<16x1xf32>
    %121 = arith.divf %119, %120 : vector<16x1xf32>
    %cst_52 = arith.constant 9.99999974E-6 : f32
    %122 = vector.broadcast %cst_52 : f32 to vector<16x1xf32>
    %123 = arith.addf %121, %122 : vector<16x1xf32>
    %124 = math.rsqrt %123 : vector<16x1xf32>
    %125 = vector.broadcast %124 : vector<16x1xf32> to vector<16x32xf32>
    %126 = arith.mulf %116, %125 : vector<16x32xf32>
    %127 = vector.broadcast %108 : vector<1x32xf32> to vector<16x32xf32>
    %128 = arith.mulf %126, %127 : vector<16x32xf32>
    %129 = vector.broadcast %110 : vector<1x32xf32> to vector<16x32xf32>
    %130 = arith.addf %128, %129 : vector<16x32xf32>
    %c0_53 = arith.constant 0 : index
    %c0_54 = arith.constant 0 : index
    %c0_55 = arith.constant 0 : index
    %131 = vector.load %arg8[%c0_53, %c0_54, %c0_55] : memref<2x32x128xf32, #tpu.memory_space<vmem>>, vector<1x32x128xf32>
    %132 = vector.shape_cast %131 : vector<1x32x128xf32> to vector<32x128xf32>
    %cst_56 = arith.constant dense<0.000000e+00> : vector<16x128xf32>
    %133 = tpu.matmul %130, %132, %cst_56 {dimension_numbers = #tpu.dot_dimension_numbers<[1], [0], [0], [1], [0, 0, 1, 1], [], []>} : vector<16x32xf32>, vector<32x128xf32>, vector<16x128xf32> -> vector<16x128xf32>
    %c0_57 = arith.constant 0 : index
    %c0_58 = arith.constant 0 : index
    %c0_59 = arith.constant 0 : index
    %134 = vector.load %arg9[%c0_57, %c0_58, %c0_59] : memref<2x1x128xf32, #tpu.memory_space<vmem>>, vector<1x1x128xf32>
    %135 = vector.shape_cast %134 : vector<1x1x128xf32> to vector<1x128xf32>
    %136 = vector.broadcast %135 : vector<1x128xf32> to vector<16x128xf32>
    %137 = arith.addf %133, %136 : vector<16x128xf32>
    %cst_60 = arith.constant 0.000000e+00 : f32
    %138 = vector.broadcast %cst_60 : f32 to vector<16x128xf32>
    %139 = arith.maximumf %137, %138 : vector<16x128xf32>
    %c0_61 = arith.constant 0 : index
    %c0_62 = arith.constant 0 : index
    %c0_63 = arith.constant 0 : index
    %140 = vector.load %arg10[%c0_61, %c0_62, %c0_63] : memref<2x128x32xf32, #tpu.memory_space<vmem>>, vector<1x128x32xf32>
    %141 = vector.shape_cast %140 : vector<1x128x32xf32> to vector<128x32xf32>
    %cst_64 = arith.constant dense<0.000000e+00> : vector<16x32xf32>
    %142 = tpu.matmul %139, %141, %cst_64 {dimension_numbers = #tpu.dot_dimension_numbers<[1], [0], [0], [1], [0, 0, 1, 1], [], []>} : vector<16x128xf32>, vector<128x32xf32>, vector<16x32xf32> -> vector<16x32xf32>
    %c0_65 = arith.constant 0 : index
    %c0_66 = arith.constant 0 : index
    %c0_67 = arith.constant 0 : index
    %143 = vector.load %arg11[%c0_65, %c0_66, %c0_67] : memref<2x1x32xf32, #tpu.memory_space<vmem>>, vector<1x1x32xf32>
    %144 = vector.shape_cast %143 : vector<1x1x32xf32> to vector<1x32xf32>
    %145 = vector.broadcast %144 : vector<1x32xf32> to vector<16x32xf32>
    %146 = arith.addf %142, %145 : vector<16x32xf32>
    %147 = arith.addf %130, %146 : vector<16x32xf32>
    %c0_68 = arith.constant 0 : index
    %c0_69 = arith.constant 0 : index
    %c0_70 = arith.constant 0 : index
    %148 = vector.load %arg14[%c0_68, %c0_69, %c0_70] : memref<2x1x32xf32, #tpu.memory_space<vmem>>, vector<1x1x32xf32>
    %149 = vector.shape_cast %148 : vector<1x1x32xf32> to vector<1x32xf32>
    %c0_71 = arith.constant 0 : index
    %c0_72 = arith.constant 0 : index
    %c0_73 = arith.constant 0 : index
    %150 = vector.load %arg15[%c0_71, %c0_72, %c0_73] : memref<2x1x32xf32, #tpu.memory_space<vmem>>, vector<1x1x32xf32>
    %151 = vector.shape_cast %150 : vector<1x1x32xf32> to vector<1x32xf32>
    %cst_74 = arith.constant dense<0.000000e+00> : vector<16xf32>
    %152 = vector.multi_reduction <add>, %147, %cst_74 [1] : vector<16x32xf32> to vector<16xf32>
    %153 = vector.shape_cast %152 : vector<16xf32> to vector<16x1xf32>
    %cst_75 = arith.constant 3.200000e+01 : f32
    %154 = vector.broadcast %cst_75 : f32 to vector<16x1xf32>
    %155 = arith.divf %153, %154 : vector<16x1xf32>
    %156 = vector.broadcast %155 : vector<16x1xf32> to vector<16x32xf32>
    %157 = arith.subf %147, %156 : vector<16x32xf32>
    %158 = arith.mulf %157, %157 : vector<16x32xf32>
    %cst_76 = arith.constant dense<0.000000e+00> : vector<16xf32>
    %159 = vector.multi_reduction <add>, %158, %cst_76 [1] : vector<16x32xf32> to vector<16xf32>
    %160 = vector.shape_cast %159 : vector<16xf32> to vector<16x1xf32>
    %cst_77 = arith.constant 3.200000e+01 : f32
    %161 = vector.broadcast %cst_77 : f32 to vector<16x1xf32>
    %162 = arith.divf %160, %161 : vector<16x1xf32>
    %cst_78 = arith.constant 9.99999974E-6 : f32
    %163 = vector.broadcast %cst_78 : f32 to vector<16x1xf32>
    %164 = arith.addf %162, %163 : vector<16x1xf32>
    %165 = math.rsqrt %164 : vector<16x1xf32>
    %166 = vector.broadcast %165 : vector<16x1xf32> to vector<16x32xf32>
    %167 = arith.mulf %157, %166 : vector<16x32xf32>
    %168 = vector.broadcast %149 : vector<1x32xf32> to vector<16x32xf32>
    %169 = arith.mulf %167, %168 : vector<16x32xf32>
    %170 = vector.broadcast %151 : vector<1x32xf32> to vector<16x32xf32>
    %171 = arith.addf %169, %170 : vector<16x32xf32>
    %c1 = arith.constant 1 : index
    %c0_79 = arith.constant 0 : index
    %c0_80 = arith.constant 0 : index
    %172 = vector.load %arg4[%c1, %c0_79, %c0_80] : memref<2x32x96xf32, #tpu.memory_space<vmem>>, vector<1x32x96xf32>
    %173 = vector.shape_cast %172 : vector<1x32x96xf32> to vector<32x96xf32>
    %cst_81 = arith.constant dense<0.000000e+00> : vector<16x96xf32>
    %174 = tpu.matmul %171, %173, %cst_81 {dimension_numbers = #tpu.dot_dimension_numbers<[1], [0], [0], [1], [0, 0, 1, 1], [], []>} : vector<16x32xf32>, vector<32x96xf32>, vector<16x96xf32> -> vector<16x96xf32>
    %c1_82 = arith.constant 1 : index
    %c0_83 = arith.constant 0 : index
    %c0_84 = arith.constant 0 : index
    %175 = vector.load %arg5[%c1_82, %c0_83, %c0_84] : memref<2x1x96xf32, #tpu.memory_space<vmem>>, vector<1x1x96xf32>
    %176 = vector.shape_cast %175 : vector<1x1x96xf32> to vector<1x96xf32>
    %177 = vector.broadcast %176 : vector<1x96xf32> to vector<16x96xf32>
    %178 = arith.addf %174, %177 : vector<16x96xf32>
    %179 = vector.extract_strided_slice %178 {offsets = [0, 0], sizes = [16, 32], strides = [1, 1]} : vector<16x96xf32> to vector<16x32xf32>
    %cst_85 = arith.constant 0.353553385 : f32
    %180 = vector.broadcast %cst_85 : f32 to vector<16x32xf32>
    %181 = arith.mulf %179, %180 : vector<16x32xf32>
    %182 = vector.shape_cast %181 : vector<16x32xf32> to vector<2x8x32xf32>
    %183 = vector.extract_strided_slice %178 {offsets = [0, 32], sizes = [16, 32], strides = [1, 1]} : vector<16x96xf32> to vector<16x32xf32>
    %184 = vector.shape_cast %183 : vector<16x32xf32> to vector<2x8x32xf32>
    %185 = vector.extract_strided_slice %178 {offsets = [0, 64], sizes = [16, 32], strides = [1, 1]} : vector<16x96xf32> to vector<16x32xf32>
    %186 = vector.shape_cast %185 : vector<16x32xf32> to vector<2x8x32xf32>
    %c1_86 = arith.constant 1 : index
    %c0_87 = arith.constant 0 : index
    %c0_88 = arith.constant 0 : index
    %187 = vector.load %arg6[%c1_86, %c0_87, %c0_88] : memref<2x32x32xf32, #tpu.memory_space<vmem>>, vector<1x32x32xf32>
    %188 = vector.shape_cast %187 : vector<1x32x32xf32> to vector<32x32xf32>
    %cst_89 = arith.constant 0.000000e+00 : f32
    %189 = vector.broadcast %cst_89 : f32 to vector<16x32xf32>
    %190 = vector.extract_strided_slice %182 {offsets = [0, 0, 0], sizes = [2, 8, 8], strides = [1, 1, 1]} : vector<2x8x32xf32> to vector<2x8x8xf32>
    %191 = vector.extract_strided_slice %184 {offsets = [0, 0, 0], sizes = [2, 8, 8], strides = [1, 1, 1]} : vector<2x8x32xf32> to vector<2x8x8xf32>
    %192 = vector.extract_strided_slice %186 {offsets = [0, 0, 0], sizes = [2, 8, 8], strides = [1, 1, 1]} : vector<2x8x32xf32> to vector<2x8x8xf32>
    %cst_90 = arith.constant dense<0.000000e+00> : vector<2x8x8xf32>
    %193 = tpu.matmul %190, %191, %cst_90 {dimension_numbers = #tpu.dot_dimension_numbers<[2], [2], [1], [1], [0, 0, 0, 1, 1, 1], [0], [0]>} : vector<2x8x8xf32>, vector<2x8x8xf32>, vector<2x8x8xf32> -> vector<2x8x8xf32>
    %cst_91 = arith.constant dense<0xFF800000> : vector<2x8xf32>
    %194 = vector.multi_reduction <maximumf>, %193, %cst_91 [2] : vector<2x8x8xf32> to vector<2x8xf32>
    %195 = vector.shape_cast %194 : vector<2x8xf32> to vector<2x8x1xf32>
    %196 = vector.broadcast %195 : vector<2x8x1xf32> to vector<2x8x8xf32>
    %197 = arith.subf %193, %196 : vector<2x8x8xf32>
    %198 = math.exp %197 : vector<2x8x8xf32>
    %cst_92 = arith.constant dense<0.000000e+00> : vector<2x8xf32>
    %199 = vector.multi_reduction <add>, %198, %cst_92 [2] : vector<2x8x8xf32> to vector<2x8xf32>
    %200 = vector.shape_cast %199 : vector<2x8xf32> to vector<2x8x1xf32>
    %201 = tpu.reciprocal %200 {approx = true} : vector<2x8x1xf32> -> vector<2x8x1xf32>
    %202 = vector.broadcast %201 : vector<2x8x1xf32> to vector<2x8x8xf32>
    %203 = arith.mulf %198, %202 : vector<2x8x8xf32>
    %cst_93 = arith.constant dense<0.000000e+00> : vector<2x8x8xf32>
    %204 = tpu.matmul %203, %192, %cst_93 {dimension_numbers = #tpu.dot_dimension_numbers<[2], [1], [1], [2], [0, 0, 0, 1, 1, 2], [0], [0]>} : vector<2x8x8xf32>, vector<2x8x8xf32>, vector<2x8x8xf32> -> vector<2x8x8xf32>
    %205 = vector.shape_cast %204 : vector<2x8x8xf32> to vector<16x8xf32>
    %206 = vector.extract_strided_slice %188 {offsets = [0, 0], sizes = [8, 32], strides = [1, 1]} : vector<32x32xf32> to vector<8x32xf32>
    %cst_94 = arith.constant dense<0.000000e+00> : vector<16x32xf32>
    %207 = tpu.matmul %205, %206, %cst_94 {dimension_numbers = #tpu.dot_dimension_numbers<[1], [0], [0], [1], [0, 0, 1, 1], [], []>} : vector<16x8xf32>, vector<8x32xf32>, vector<16x32xf32> -> vector<16x32xf32>
    %208 = arith.addf %189, %207 : vector<16x32xf32>
    %209 = vector.extract_strided_slice %182 {offsets = [0, 0, 8], sizes = [2, 8, 8], strides = [1, 1, 1]} : vector<2x8x32xf32> to vector<2x8x8xf32>
    %210 = vector.extract_strided_slice %184 {offsets = [0, 0, 8], sizes = [2, 8, 8], strides = [1, 1, 1]} : vector<2x8x32xf32> to vector<2x8x8xf32>
    %211 = vector.extract_strided_slice %186 {offsets = [0, 0, 8], sizes = [2, 8, 8], strides = [1, 1, 1]} : vector<2x8x32xf32> to vector<2x8x8xf32>
    %cst_95 = arith.constant dense<0.000000e+00> : vector<2x8x8xf32>
    %212 = tpu.matmul %209, %210, %cst_95 {dimension_numbers = #tpu.dot_dimension_numbers<[2], [2], [1], [1], [0, 0, 0, 1, 1, 1], [0], [0]>} : vector<2x8x8xf32>, vector<2x8x8xf32>, vector<2x8x8xf32> -> vector<2x8x8xf32>
    %cst_96 = arith.constant dense<0xFF800000> : vector<2x8xf32>
    %213 = vector.multi_reduction <maximumf>, %212, %cst_96 [2] : vector<2x8x8xf32> to vector<2x8xf32>
    %214 = vector.shape_cast %213 : vector<2x8xf32> to vector<2x8x1xf32>
    %215 = vector.broadcast %214 : vector<2x8x1xf32> to vector<2x8x8xf32>
    %216 = arith.subf %212, %215 : vector<2x8x8xf32>
    %217 = math.exp %216 : vector<2x8x8xf32>
    %cst_97 = arith.constant dense<0.000000e+00> : vector<2x8xf32>
    %218 = vector.multi_reduction <add>, %217, %cst_97 [2] : vector<2x8x8xf32> to vector<2x8xf32>
    %219 = vector.shape_cast %218 : vector<2x8xf32> to vector<2x8x1xf32>
    %220 = tpu.reciprocal %219 {approx = true} : vector<2x8x1xf32> -> vector<2x8x1xf32>
    %221 = vector.broadcast %220 : vector<2x8x1xf32> to vector<2x8x8xf32>
    %222 = arith.mulf %217, %221 : vector<2x8x8xf32>
    %cst_98 = arith.constant dense<0.000000e+00> : vector<2x8x8xf32>
    %223 = tpu.matmul %222, %211, %cst_98 {dimension_numbers = #tpu.dot_dimension_numbers<[2], [1], [1], [2], [0, 0, 0, 1, 1, 2], [0], [0]>} : vector<2x8x8xf32>, vector<2x8x8xf32>, vector<2x8x8xf32> -> vector<2x8x8xf32>
    %224 = vector.shape_cast %223 : vector<2x8x8xf32> to vector<16x8xf32>
    %225 = vector.extract_strided_slice %188 {offsets = [8, 0], sizes = [8, 32], strides = [1, 1]} : vector<32x32xf32> to vector<8x32xf32>
    %cst_99 = arith.constant dense<0.000000e+00> : vector<16x32xf32>
    %226 = tpu.matmul %224, %225, %cst_99 {dimension_numbers = #tpu.dot_dimension_numbers<[1], [0], [0], [1], [0, 0, 1, 1], [], []>} : vector<16x8xf32>, vector<8x32xf32>, vector<16x32xf32> -> vector<16x32xf32>
    %227 = arith.addf %208, %226 : vector<16x32xf32>
    %228 = vector.extract_strided_slice %182 {offsets = [0, 0, 16], sizes = [2, 8, 8], strides = [1, 1, 1]} : vector<2x8x32xf32> to vector<2x8x8xf32>
    %229 = vector.extract_strided_slice %184 {offsets = [0, 0, 16], sizes = [2, 8, 8], strides = [1, 1, 1]} : vector<2x8x32xf32> to vector<2x8x8xf32>
    %230 = vector.extract_strided_slice %186 {offsets = [0, 0, 16], sizes = [2, 8, 8], strides = [1, 1, 1]} : vector<2x8x32xf32> to vector<2x8x8xf32>
    %cst_100 = arith.constant dense<0.000000e+00> : vector<2x8x8xf32>
    %231 = tpu.matmul %228, %229, %cst_100 {dimension_numbers = #tpu.dot_dimension_numbers<[2], [2], [1], [1], [0, 0, 0, 1, 1, 1], [0], [0]>} : vector<2x8x8xf32>, vector<2x8x8xf32>, vector<2x8x8xf32> -> vector<2x8x8xf32>
    %cst_101 = arith.constant dense<0xFF800000> : vector<2x8xf32>
    %232 = vector.multi_reduction <maximumf>, %231, %cst_101 [2] : vector<2x8x8xf32> to vector<2x8xf32>
    %233 = vector.shape_cast %232 : vector<2x8xf32> to vector<2x8x1xf32>
    %234 = vector.broadcast %233 : vector<2x8x1xf32> to vector<2x8x8xf32>
    %235 = arith.subf %231, %234 : vector<2x8x8xf32>
    %236 = math.exp %235 : vector<2x8x8xf32>
    %cst_102 = arith.constant dense<0.000000e+00> : vector<2x8xf32>
    %237 = vector.multi_reduction <add>, %236, %cst_102 [2] : vector<2x8x8xf32> to vector<2x8xf32>
    %238 = vector.shape_cast %237 : vector<2x8xf32> to vector<2x8x1xf32>
    %239 = tpu.reciprocal %238 {approx = true} : vector<2x8x1xf32> -> vector<2x8x1xf32>
    %240 = vector.broadcast %239 : vector<2x8x1xf32> to vector<2x8x8xf32>
    %241 = arith.mulf %236, %240 : vector<2x8x8xf32>
    %cst_103 = arith.constant dense<0.000000e+00> : vector<2x8x8xf32>
    %242 = tpu.matmul %241, %230, %cst_103 {dimension_numbers = #tpu.dot_dimension_numbers<[2], [1], [1], [2], [0, 0, 0, 1, 1, 2], [0], [0]>} : vector<2x8x8xf32>, vector<2x8x8xf32>, vector<2x8x8xf32> -> vector<2x8x8xf32>
    %243 = vector.shape_cast %242 : vector<2x8x8xf32> to vector<16x8xf32>
    %244 = vector.extract_strided_slice %188 {offsets = [16, 0], sizes = [8, 32], strides = [1, 1]} : vector<32x32xf32> to vector<8x32xf32>
    %cst_104 = arith.constant dense<0.000000e+00> : vector<16x32xf32>
    %245 = tpu.matmul %243, %244, %cst_104 {dimension_numbers = #tpu.dot_dimension_numbers<[1], [0], [0], [1], [0, 0, 1, 1], [], []>} : vector<16x8xf32>, vector<8x32xf32>, vector<16x32xf32> -> vector<16x32xf32>
    %246 = arith.addf %227, %245 : vector<16x32xf32>
    %247 = vector.extract_strided_slice %182 {offsets = [0, 0, 24], sizes = [2, 8, 8], strides = [1, 1, 1]} : vector<2x8x32xf32> to vector<2x8x8xf32>
    %248 = vector.extract_strided_slice %184 {offsets = [0, 0, 24], sizes = [2, 8, 8], strides = [1, 1, 1]} : vector<2x8x32xf32> to vector<2x8x8xf32>
    %249 = vector.extract_strided_slice %186 {offsets = [0, 0, 24], sizes = [2, 8, 8], strides = [1, 1, 1]} : vector<2x8x32xf32> to vector<2x8x8xf32>
    %cst_105 = arith.constant dense<0.000000e+00> : vector<2x8x8xf32>
    %250 = tpu.matmul %247, %248, %cst_105 {dimension_numbers = #tpu.dot_dimension_numbers<[2], [2], [1], [1], [0, 0, 0, 1, 1, 1], [0], [0]>} : vector<2x8x8xf32>, vector<2x8x8xf32>, vector<2x8x8xf32> -> vector<2x8x8xf32>
    %cst_106 = arith.constant dense<0xFF800000> : vector<2x8xf32>
    %251 = vector.multi_reduction <maximumf>, %250, %cst_106 [2] : vector<2x8x8xf32> to vector<2x8xf32>
    %252 = vector.shape_cast %251 : vector<2x8xf32> to vector<2x8x1xf32>
    %253 = vector.broadcast %252 : vector<2x8x1xf32> to vector<2x8x8xf32>
    %254 = arith.subf %250, %253 : vector<2x8x8xf32>
    %255 = math.exp %254 : vector<2x8x8xf32>
    %cst_107 = arith.constant dense<0.000000e+00> : vector<2x8xf32>
    %256 = vector.multi_reduction <add>, %255, %cst_107 [2] : vector<2x8x8xf32> to vector<2x8xf32>
    %257 = vector.shape_cast %256 : vector<2x8xf32> to vector<2x8x1xf32>
    %258 = tpu.reciprocal %257 {approx = true} : vector<2x8x1xf32> -> vector<2x8x1xf32>
    %259 = vector.broadcast %258 : vector<2x8x1xf32> to vector<2x8x8xf32>
    %260 = arith.mulf %255, %259 : vector<2x8x8xf32>
    %cst_108 = arith.constant dense<0.000000e+00> : vector<2x8x8xf32>
    %261 = tpu.matmul %260, %249, %cst_108 {dimension_numbers = #tpu.dot_dimension_numbers<[2], [1], [1], [2], [0, 0, 0, 1, 1, 2], [0], [0]>} : vector<2x8x8xf32>, vector<2x8x8xf32>, vector<2x8x8xf32> -> vector<2x8x8xf32>
    %262 = vector.shape_cast %261 : vector<2x8x8xf32> to vector<16x8xf32>
    %263 = vector.extract_strided_slice %188 {offsets = [24, 0], sizes = [8, 32], strides = [1, 1]} : vector<32x32xf32> to vector<8x32xf32>
    %cst_109 = arith.constant dense<0.000000e+00> : vector<16x32xf32>
    %264 = tpu.matmul %262, %263, %cst_109 {dimension_numbers = #tpu.dot_dimension_numbers<[1], [0], [0], [1], [0, 0, 1, 1], [], []>} : vector<16x8xf32>, vector<8x32xf32>, vector<16x32xf32> -> vector<16x32xf32>
    %265 = arith.addf %246, %264 : vector<16x32xf32>
    %c1_110 = arith.constant 1 : index
    %c0_111 = arith.constant 0 : index
    %c0_112 = arith.constant 0 : index
    %266 = vector.load %arg7[%c1_110, %c0_111, %c0_112] : memref<2x1x32xf32, #tpu.memory_space<vmem>>, vector<1x1x32xf32>
    %267 = vector.shape_cast %266 : vector<1x1x32xf32> to vector<1x32xf32>
    %268 = vector.broadcast %267 : vector<1x32xf32> to vector<16x32xf32>
    %269 = arith.addf %265, %268 : vector<16x32xf32>
    %270 = arith.addf %171, %269 : vector<16x32xf32>
    %c1_113 = arith.constant 1 : index
    %c0_114 = arith.constant 0 : index
    %c0_115 = arith.constant 0 : index
    %271 = vector.load %arg12[%c1_113, %c0_114, %c0_115] : memref<2x1x32xf32, #tpu.memory_space<vmem>>, vector<1x1x32xf32>
    %272 = vector.shape_cast %271 : vector<1x1x32xf32> to vector<1x32xf32>
    %c1_116 = arith.constant 1 : index
    %c0_117 = arith.constant 0 : index
    %c0_118 = arith.constant 0 : index
    %273 = vector.load %arg13[%c1_116, %c0_117, %c0_118] : memref<2x1x32xf32, #tpu.memory_space<vmem>>, vector<1x1x32xf32>
    %274 = vector.shape_cast %273 : vector<1x1x32xf32> to vector<1x32xf32>
    %cst_119 = arith.constant dense<0.000000e+00> : vector<16xf32>
    %275 = vector.multi_reduction <add>, %270, %cst_119 [1] : vector<16x32xf32> to vector<16xf32>
    %276 = vector.shape_cast %275 : vector<16xf32> to vector<16x1xf32>
    %cst_120 = arith.constant 3.200000e+01 : f32
    %277 = vector.broadcast %cst_120 : f32 to vector<16x1xf32>
    %278 = arith.divf %276, %277 : vector<16x1xf32>
    %279 = vector.broadcast %278 : vector<16x1xf32> to vector<16x32xf32>
    %280 = arith.subf %270, %279 : vector<16x32xf32>
    %281 = arith.mulf %280, %280 : vector<16x32xf32>
    %cst_121 = arith.constant dense<0.000000e+00> : vector<16xf32>
    %282 = vector.multi_reduction <add>, %281, %cst_121 [1] : vector<16x32xf32> to vector<16xf32>
    %283 = vector.shape_cast %282 : vector<16xf32> to vector<16x1xf32>
    %cst_122 = arith.constant 3.200000e+01 : f32
    %284 = vector.broadcast %cst_122 : f32 to vector<16x1xf32>
    %285 = arith.divf %283, %284 : vector<16x1xf32>
    %cst_123 = arith.constant 9.99999974E-6 : f32
    %286 = vector.broadcast %cst_123 : f32 to vector<16x1xf32>
    %287 = arith.addf %285, %286 : vector<16x1xf32>
    %288 = math.rsqrt %287 : vector<16x1xf32>
    %289 = vector.broadcast %288 : vector<16x1xf32> to vector<16x32xf32>
    %290 = arith.mulf %280, %289 : vector<16x32xf32>
    %291 = vector.broadcast %272 : vector<1x32xf32> to vector<16x32xf32>
    %292 = arith.mulf %290, %291 : vector<16x32xf32>
    %293 = vector.broadcast %274 : vector<1x32xf32> to vector<16x32xf32>
    %294 = arith.addf %292, %293 : vector<16x32xf32>
    %c1_124 = arith.constant 1 : index
    %c0_125 = arith.constant 0 : index
    %c0_126 = arith.constant 0 : index
    %295 = vector.load %arg8[%c1_124, %c0_125, %c0_126] : memref<2x32x128xf32, #tpu.memory_space<vmem>>, vector<1x32x128xf32>
    %296 = vector.shape_cast %295 : vector<1x32x128xf32> to vector<32x128xf32>
    %cst_127 = arith.constant dense<0.000000e+00> : vector<16x128xf32>
    %297 = tpu.matmul %294, %296, %cst_127 {dimension_numbers = #tpu.dot_dimension_numbers<[1], [0], [0], [1], [0, 0, 1, 1], [], []>} : vector<16x32xf32>, vector<32x128xf32>, vector<16x128xf32> -> vector<16x128xf32>
    %c1_128 = arith.constant 1 : index
    %c0_129 = arith.constant 0 : index
    %c0_130 = arith.constant 0 : index
    %298 = vector.load %arg9[%c1_128, %c0_129, %c0_130] : memref<2x1x128xf32, #tpu.memory_space<vmem>>, vector<1x1x128xf32>
    %299 = vector.shape_cast %298 : vector<1x1x128xf32> to vector<1x128xf32>
    %300 = vector.broadcast %299 : vector<1x128xf32> to vector<16x128xf32>
    %301 = arith.addf %297, %300 : vector<16x128xf32>
    %cst_131 = arith.constant 0.000000e+00 : f32
    %302 = vector.broadcast %cst_131 : f32 to vector<16x128xf32>
    %303 = arith.maximumf %301, %302 : vector<16x128xf32>
    %c1_132 = arith.constant 1 : index
    %c0_133 = arith.constant 0 : index
    %c0_134 = arith.constant 0 : index
    %304 = vector.load %arg10[%c1_132, %c0_133, %c0_134] : memref<2x128x32xf32, #tpu.memory_space<vmem>>, vector<1x128x32xf32>
    %305 = vector.shape_cast %304 : vector<1x128x32xf32> to vector<128x32xf32>
    %cst_135 = arith.constant dense<0.000000e+00> : vector<16x32xf32>
    %306 = tpu.matmul %303, %305, %cst_135 {dimension_numbers = #tpu.dot_dimension_numbers<[1], [0], [0], [1], [0, 0, 1, 1], [], []>} : vector<16x128xf32>, vector<128x32xf32>, vector<16x32xf32> -> vector<16x32xf32>
    %c1_136 = arith.constant 1 : index
    %c0_137 = arith.constant 0 : index
    %c0_138 = arith.constant 0 : index
    %307 = vector.load %arg11[%c1_136, %c0_137, %c0_138] : memref<2x1x32xf32, #tpu.memory_space<vmem>>, vector<1x1x32xf32>
    %308 = vector.shape_cast %307 : vector<1x1x32xf32> to vector<1x32xf32>
    %309 = vector.broadcast %308 : vector<1x32xf32> to vector<16x32xf32>
    %310 = arith.addf %306, %309 : vector<16x32xf32>
    %311 = arith.addf %294, %310 : vector<16x32xf32>
    %c1_139 = arith.constant 1 : index
    %c0_140 = arith.constant 0 : index
    %c0_141 = arith.constant 0 : index
    %312 = vector.load %arg14[%c1_139, %c0_140, %c0_141] : memref<2x1x32xf32, #tpu.memory_space<vmem>>, vector<1x1x32xf32>
    %313 = vector.shape_cast %312 : vector<1x1x32xf32> to vector<1x32xf32>
    %c1_142 = arith.constant 1 : index
    %c0_143 = arith.constant 0 : index
    %c0_144 = arith.constant 0 : index
    %314 = vector.load %arg15[%c1_142, %c0_143, %c0_144] : memref<2x1x32xf32, #tpu.memory_space<vmem>>, vector<1x1x32xf32>
    %315 = vector.shape_cast %314 : vector<1x1x32xf32> to vector<1x32xf32>
    %cst_145 = arith.constant dense<0.000000e+00> : vector<16xf32>
    %316 = vector.multi_reduction <add>, %311, %cst_145 [1] : vector<16x32xf32> to vector<16xf32>
    %317 = vector.shape_cast %316 : vector<16xf32> to vector<16x1xf32>
    %cst_146 = arith.constant 3.200000e+01 : f32
    %318 = vector.broadcast %cst_146 : f32 to vector<16x1xf32>
    %319 = arith.divf %317, %318 : vector<16x1xf32>
    %320 = vector.broadcast %319 : vector<16x1xf32> to vector<16x32xf32>
    %321 = arith.subf %311, %320 : vector<16x32xf32>
    %322 = arith.mulf %321, %321 : vector<16x32xf32>
    %cst_147 = arith.constant dense<0.000000e+00> : vector<16xf32>
    %323 = vector.multi_reduction <add>, %322, %cst_147 [1] : vector<16x32xf32> to vector<16xf32>
    %324 = vector.shape_cast %323 : vector<16xf32> to vector<16x1xf32>
    %cst_148 = arith.constant 3.200000e+01 : f32
    %325 = vector.broadcast %cst_148 : f32 to vector<16x1xf32>
    %326 = arith.divf %324, %325 : vector<16x1xf32>
    %cst_149 = arith.constant 9.99999974E-6 : f32
    %327 = vector.broadcast %cst_149 : f32 to vector<16x1xf32>
    %328 = arith.addf %326, %327 : vector<16x1xf32>
    %329 = math.rsqrt %328 : vector<16x1xf32>
    %330 = vector.broadcast %329 : vector<16x1xf32> to vector<16x32xf32>
    %331 = arith.mulf %321, %330 : vector<16x32xf32>
    %332 = vector.broadcast %313 : vector<1x32xf32> to vector<16x32xf32>
    %333 = arith.mulf %331, %332 : vector<16x32xf32>
    %334 = vector.broadcast %315 : vector<1x32xf32> to vector<16x32xf32>
    %335 = arith.addf %333, %334 : vector<16x32xf32>
    %c0_150 = arith.constant 0 : index
    %c0_151 = arith.constant 0 : index
    %336 = vector.load %arg16[%c0_150, %c0_151] : memref<16x32xf32, #tpu.memory_space<vmem>>, vector<16x32xf32>
    tpu.vector_store %arg16[%c0_150, %c0_151], %335 {strides = array<i32>} : memref<16x32xf32, #tpu.memory_space<vmem>>, vector<16x32xf32>,
    return
  }
}

</mosaic_0001>

<bundles_post_ra>
// kernel: custom_transformer_forward.1
= control target key start
LH: loop header
LB: loop body
LE: loop exit
PB: predicated region body
PF: predicated region fallthrough
CT: control target
= control target key end

     0   :  { %vm168_vm0 = vcmask 261120   ;;  %v5129_v41 = vmov 0.0   ;;  %vm5130_vm1 = vmmov 0   ;;  %s5131_s28 = smov 96   ;;  %vm259_vm2 = vcmask 64512   ;;  %s5132_s29 = smov 64   ;;  %s5896_s1 = inlined_call_operand.vmem [shape: f32[128,32], index: 1, kind: input, shape index: {}]   ;;  %s5897_s0 = inlined_call_operand.vmem [shape: f32[16,128], index: 0, kind: input, shape index: {}]   ;;  %s5898_s4 = inlined_call_operand.vmem [shape: f32[2,32,96], index: 4, kind: input, shape index: {}]   ;;  %s5899_s2 = inlined_call_operand.vmem [shape: f32[1,32], index: 2, kind: input, shape index: {}]   ;;  %s5900_s3 = inlined_call_operand.vmem [shape: f32[16,32], index: 3, kind: input, shape index: {}]   ;;  %s5901_s5 = inlined_call_operand.vmem [shape: f32[2,1,96], index: 5, kind: input, shape index: {}]   ;;  %s5902_s6 = inlined_call_operand.vmem [shape: f32[2,32,32], index: 6, kind: input, shape index: {}]   ;;  %s5903_s7 = inlined_call_operand.vmem [shape: f32[2,1,32], index: 7, kind: input, shape index: {}]   ;;  %s5904_s8 = inlined_call_operand.vmem [shape: f32[2,32,128], index: 8, kind: input, shape index: {}]   ;;  %s5905_s10 = inlined_call_operand.vmem [shape: f32[2,128,32], index: 10, kind: input, shape index: {}]   ;;  %s5906_s12 = inlined_call_operand.vmem [shape: f32[2,1,32], index: 12, kind: input, shape index: {}]   ;;  %s5907_s13 = inlined_call_operand.vmem [shape: f32[2,1,32], index: 13, kind: input, shape index: {}]   ;;  %s5908_s9 = inlined_call_operand.vmem [shape: f32[2,1,128], index: 9, kind: input, shape index: {}]   ;;  %s5909_s11 = inlined_call_operand.vmem [shape: f32[2,1,32], index: 11, kind: input, shape index: {}]   ;;  %s5910_s14 = inlined_call_operand.vmem [shape: f32[2,1,32], index: 14, kind: input, shape index: {}]   ;;  %s5911_s15 = inlined_call_operand.vmem [shape: f32[2,1,32], index: 15, kind: input, shape index: {}]   ;;  %s5912_s16 = inlined_call_operand.vmem [shape: f32[16,32], index: 16, kind: output, shape index: {}]  }
   0x1   :  { %5920 = sst [smem:[#allocation2_spill]] %s5896_s1  ;;  %v53_v10 = vld [vmem:[%s5897_s0] sm:$0xff]  ;;  %v158_v13 = vld [vmem:[%s5898_s4 + $0x8] sm:$0xff]  ;;  %v159_v29 = vld [vmem:[%s5898_s4 + $0x10] sm:$0xff]  ;;  %s5133_s30 = smov 88  }
   0x2   :  { %s5921_s23 = sld [smem:[#allocation2_spill]]  ;;  %4579 = vmatprep.mubr.f32.mxu0 %v53_v10  ;;  %v157_v12 = vld [vmem:[%s5898_s4] sm:$0xff]  ;;  %v54_v28 = vld [vmem:[%s5897_s0 + $0x8] sm:$0xff]  ;;  %v160_v30 = vld [vmem:[%s5898_s4 + $0x18] sm:$0xff]  ;;  %s5134_s1 = smov 120  }
   0x3   :  { %v4928_v14 = vpack.c.bf16 %v158_v13, %v157_v12  ;;  %v4932_v31 = vpack.c.bf16 %v160_v30, %v159_v29  ;;  %v4256_v32 = vld [vmem:[%s5899_s2] ss:$0 sm:$0xff]  ;;  %v154_v37 = vld [vmem:[%s5900_s3 + $0x8] sm:$0xff]  ;;  %s5135_s17 = smov 56   ;;  %s5136_s18 = smov 80  }
   0x4   :  { %v153_v36 = vld [vmem:[%s5900_s3] sm:$0xff]  ;;  %s5137_s19 = smov 112   ;;  %s5138_s24 = smov 48  }
   0x5   :  { %4929 = vmatprep.subr.bf16.mxu1 %v4928_v14  ;;  %v4257_v42 = vld [vmem:[%s5901_s5] ss:$0 sm:$0xff]  ;;  %s5918_s0 = smov 72   ;;  %s5916_s25 = smov 104  }
   0x6   :  { %4931 = vmatpush3.bf16.msra.mxu1 %v4928_v14  ;;  %s5914_s2 = smov 40  }
   0x7   :  { %4933 = vmatprep.subr.bf16.mxu1 %v4932_v31 }
   0x8   :  { %v55_v0 = vld [vmem:[%s5921_s23] sm:$0xff]  ;;  %v56_v1 = vld [vmem:[%s5921_s23 + $0x8] sm:$0xff]  ;;  %v57_v2 = vld [vmem:[%s5921_s23 + $0x10] sm:$0xff] }
   0x9   :  { %v4896_v3 = vpack.c.bf16 %v56_v1, %v55_v0  ;;  %v58_v4 = vld [vmem:[%s5921_s23 + $0x18] sm:$0xff]  ;;  %v59_v6 = vld [vmem:[%s5921_s23 + $0x20] sm:$0xff]  ;;  %v60_v7 = vld [vmem:[%s5921_s23 + $0x28] sm:$0xff] }
   0xa   :  { %v4900_v5 = vpack.c.bf16 %v58_v4, %v57_v2  ;;  %v4904_v8 = vpack.c.bf16 %v60_v7, %v59_v6  ;;  %v61_v9 = vld [vmem:[%s5921_s23 + $0x30] sm:$0xff]  ;;  %v62_v11 = vld [vmem:[%s5921_s23 + $0x38] sm:$0xff]  ;;  %v63_v16 = vld [vmem:[%s5921_s23 + $0x40] sm:$0xff]  ;;  %4935 = vmatpush3.bf16.msra.mxu1 %v4932_v31 }
   0xb   :  { %4897 = vmatprep.subr.bf16.mxu0 %v4896_v3  ;;  %v4908_v15 = vpack.c.bf16 %v62_v11, %v61_v9  ;;  %v64_v17 = vld [vmem:[%s5921_s23 + $0x48] sm:$0xff]  ;;  %v65_v19 = vld [vmem:[%s5921_s23 + $0x50] sm:$0xff]  ;;  %v66_v20 = vld [vmem:[%s5921_s23 + $0x58] sm:$0xff]  ;;  %4593 = vmatprep.subr.mxu1 %v5129_v41 }
   0xc   :  { %4899 = vmatpush3.bf16.msra.mxu0 %v4896_v3  ;;  %v4912_v18 = vpack.c.bf16 %v64_v17, %v63_v16  ;;  %v4916_v21 = vpack.c.bf16 %v66_v20, %v65_v19  ;;  %v67_v22 = vld [vmem:[%s5921_s23 + $0x60] sm:$0xff]  ;;  %v68_v23 = vld [vmem:[%s5921_s23 + $0x68] sm:$0xff]  ;;  %v69_v25 = vld [vmem:[%s5921_s23 + $0x70] sm:$0xff] }
   0xd   :  { %4901 = vmatprep.subr.bf16.mxu0 %v4900_v5  ;;  %v4920_v24 = vpack.c.bf16 %v68_v23, %v67_v22  ;;  %v70_v26 = vld [vmem:[%s5921_s23 + $0x78] sm:$0xff] }
   0xe   :  { %v4924_v27 = vpack.c.bf16 %v70_v26, %v69_v25 }
  0x10   :  { %4903 = vmatpush3.bf16.msra.mxu0 %v4900_v5 }
  0x11   :  { %4905 = vmatprep.subr.bf16.mxu0 %v4904_v8 }
  0x14   :  { %4907 = vmatpush3.bf16.msra.mxu0 %v4904_v8 }
  0x15   :  { %4909 = vmatprep.subr.bf16.mxu0 %v4908_v15 }
  0x18   :  { %4911 = vmatpush3.bf16.msra.mxu0 %v4908_v15 }
  0x19   :  { %4913 = vmatprep.subr.bf16.mxu0 %v4912_v18 }
  0x1c   :  { %4915 = vmatpush3.bf16.msra.mxu0 %v4912_v18 }
  0x1d   :  { %4917 = vmatprep.subr.bf16.mxu0 %v4916_v21 }
  0x20   :  { %4919 = vmatpush3.bf16.msra.mxu0 %v4916_v21 }
  0x21   :  { %4921 = vmatprep.subr.bf16.mxu0 %v4920_v24 }
  0x24   :  { %4923 = vmatpush3.bf16.msra.mxu0 %v4920_v24 }
  0x25   :  { %4925 = vmatprep.subr.bf16.mxu0 %v4924_v27 }
  0x28   :  { %4927 = vmatpush3.bf16.msra.mxu0 %v4924_v27 }
  0x2b   :  { %4580 = vmatmul.mubr.f32.vlgmr.msra.gmra.mrb[0].mxu0 %v54_v28 }
  0xfe   :  { %v4581_v33 = vpop.f32.mrb[0].mxu0 }
  0xff   :  { %v150_v34 = vadd.f32 %v4581_v33, %v4256_v32  ;;  %v144_v35 = vpop.f32.mrb[1].mxu0 }
 0x100   :  { %v145_v38 = vadd.f32 %v4256_v32, %v144_v35 }
 0x101   :  { %v5304_v40 = vadd.f32 %v154_v37, %v150_v34 }
 0x102   :  { %v5302_v39 = vadd.f32 %v153_v36, %v145_v38 }
 0x104   :  { %4590 = vmatprep.mubr.msk.f32.mxu1 %vm168_vm0, %v5302_v39 }
 0x105   :  { %4591 = vmatmul.mubr.msk.f32.vlgmr.msra.gmra.mrb[0].mxu1 %vm168_vm0, %v5304_v40 }
 0x106   :  { %4595 = vmatprep.mubr.msk.f32.mxu1 %vm5130_vm1, %v5129_v41 }
 0x1d8   :  { %v4592_v43 = vpop.f32.mrb[0].mxu1 }
 0x1d9   :  { %v241_v44 = vpop.f32.mrb[1].mxu1  ;;  %v5320_v46 = vadd.f32 %v4592_v43, %v4257_v42 }
 0x1da   :  { %v5316_v45 = vadd.f32 %v4257_v42, %v241_v44 }
 0x1db   :  { %v5335_v50 = vmul.f32 0.35355338, %v5320_v46 }
 0x1dc   :  { %257 = vrot.lane.b32.xlu0 %v5316_v45, %s5131_s28  ;;  %v5327_v48 = vmul.f32 0.35355338, %v5316_v45 }
 0x1e0   :  { %336 = vrot.lane.b32.xlu0 %v5320_v46, %s5131_s28 }
 0x24e   :  { %v258_v47 = vpop.permute.xlu0 %257 }
 0x24f   :  { %4594 = vmatpush3.xpose.msk.msra.mxu1 %vm259_vm2, %v258_v47 }
 0x250   :  { %4598 = vmatprep.subr.mxu1 %v5129_v41 }
 0x252   :  { %v337_v49 = vpop.permute.xlu0 %336  ;;  %4596 = vmatmul.mubr.msk.f32.vlgmr.msra.gmra.mrb[2].mxu1 %vm259_vm2, %v5327_v48 }
 0x253   :  { %4599 = vmatpush3.xpose.msk.msra.mxu1 %vm259_vm2, %v337_v49  ;;  %4600 = vmatprep.mubr.msk.f32.mxu1 %vm5130_vm1, %v5129_v41  ;;  %v253_v49 = vld [vmem:[%s5902_s6 + $0x8] sm:$0xff] }
 0x254   :  { %4603 = vmatprep.subr.mxu1 %v5129_v41 }
 0x256   :  { %4601 = vmatmul.mubr.msk.f32.vlgmr.msra.gmra.mrb[4].mxu1 %vm259_vm2, %v5335_v50 }
 0x257   :  { %4605 = vmatprep.mubr.msk.f32.mxu1 %vm5130_vm1, %v5129_v41 }
 0x325   :  { %v331_v51 = vpop.f32.mrb[2].mxu1 }
 0x326   :  { %v4597_v52 = vpop.f32.mrb[3].mxu1  ;;  %v413_v53 = vsel %vm259_vm2, %v331_v51, -inf }
 0x327   :  { %414 = vmax.xlane.f32.xlu1 %v413_v53 }
 0x329   :  { %v409_v54 = vpop.f32.mrb[4].mxu1 }
 0x32a   :  { %v4602_v55 = vpop.f32.mrb[5].mxu1  ;;  %v416_v56 = vsel %vm259_vm2, %v409_v54, -inf }
 0x32b   :  { %417 = vmax.xlane.f32.xlu1 %v416_v56 }
 0x33c   :  { %435 = vrot.lane.b32.xlu1 %v5316_v45, %s5132_s29 }
 0x340   :  { %511 = vrot.lane.b32.xlu1 %v5320_v46, %s5132_s29 }
 0x344   :  { %589 = vrot.lane.b32.xlu1 %v5316_v45, %s5133_s30 }
 0x348   :  { %587 = vrot.lane.b32.xlu1 %v5327_v48, %s5134_s1 }
 0x3b4   :  { %v415_v57 = vpop.xlane.xlu1 %414 }
 0x3b5   :  { %v419_v58 = vsub.f32 %v331_v51, %v415_v57  ;;  %v252_v51 = vld [vmem:[%s5902_s6] sm:$0xff] }
 0x3b7   :  { %v421_v59 = vmul.f32 1.442695, %v419_v58 }
 0x3b8   :  { %v418_v60 = vpop.xlane.xlu1 %417 }
 0x3b9   :  { %5049 = vpow2.f32 %v421_v59  ;;  %v420_v61 = vsub.f32 %v409_v54, %v418_v60 }
 0x3bb   :  { %v423_v62 = vmul.f32 1.442695, %v420_v61 }
 0x3bc   :  { %v436_v63 = vpop.permute.xlu1 %435 }
 0x3bd   :  { %5051 = vpow2.f32 %v423_v62  ;;  %4604 = vmatpush3.msra.mxu1 %v436_v63 }
 0x3be   :  { %4608 = vmatprep.subr.mxu1 %v5129_v41 }
 0x3c0   :  { %v512_v4 = vpop.permute.xlu1 %511 }
 0x3c3   :  { %v5050_v0 = vpop.eup %5049 }
 0x3c4   :  { %v425_v1 = vsel %vm259_vm2, %v5050_v0, 0.0  ;;  %v590_v5 = vpop.permute.xlu1 %589 }
 0x3c5   :  { %426 = vadd.xlane.f32.xlu0 %v425_v1 }
 0x3c7   :  { %v5052_v2 = vpop.eup %5051 }
 0x3c8   :  { %v428_v3 = vsel %vm259_vm2, %v5052_v2, 0.0  ;;  %v588_v6 = vpop.permute.xlu1 %587 }
 0x3c9   :  { %429 = vadd.xlane.f32.xlu1 %v428_v3 }
 0x3da   :  { %665 = vrot.lane.b32.xlu1 %v5335_v50, %s5134_s1 }
 0x3db   :  { %667 = vrot.lane.b32.xlu0 %v5320_v46, %s5133_s30 }
 0x452   :  { %v427_v7 = vpop.xlane.xlu0 %426 }
 0x453   :  { %5053 = vrcp.f32 %v427_v7 }
 0x456   :  { %v430_v8 = vpop.xlane.xlu1 %429  ;;  %v668_v13 = vpop.permute.xlu0 %667 }
 0x457   :  { %5055 = vrcp.f32 %v430_v8 }
 0x45a   :  { %v666_v14 = vpop.permute.xlu1 %665 }
 0x45d   :  { %v5054_v9 = vpop.eup %5053 }
 0x45e   :  { %v433_v10 = vmul.f32 %v5054_v9, %v5050_v0 }
 0x460   :  { %4606 = vmatmul.mubr.msk.f32.vlgmr.msra.gmra.mrb[6].mxu1 %vm259_vm2, %v433_v10 }
 0x461   :  { %v5056_v11 = vpop.eup %5055  ;;  %4609 = vmatpush3.msra.mxu1 %v512_v4  ;;  %4610 = vmatprep.mubr.msk.f32.mxu1 %vm5130_vm1, %v5129_v41 }
 0x462   :  { %v434_v12 = vmul.f32 %v5056_v11, %v5052_v2  ;;  %4613 = vmatprep.subr.mxu1 %v5129_v41 }
 0x464   :  { %4611 = vmatmul.mubr.msk.f32.vlgmr.msra.gmra.mrb[8].mxu1 %vm259_vm2, %v434_v12 }
 0x465   :  { %4615 = vmatprep.mubr.msk.f32.mxu1 %vm5130_vm1, %v5129_v41 }
 0x468   :  { %4614 = vmatpush3.xpose.msk.msra.mxu1 %vm259_vm2, %v590_v5 }
 0x469   :  { %4618 = vmatprep.subr.mxu1 %v5129_v41 }
 0x46b   :  { %4616 = vmatmul.mubr.msk.f32.vlgmr.msra.gmra.mrb[10].mxu1 %vm259_vm2, %v588_v6 }
 0x46c   :  { %4619 = vmatpush3.xpose.msk.msra.mxu1 %vm259_vm2, %v668_v13  ;;  %4620 = vmatprep.mubr.msk.f32.mxu1 %vm5130_vm1, %v5129_v41 }
 0x46d   :  { %4623 = vmatprep.subr.mxu1 %v5129_v41 }
 0x46f   :  { %4621 = vmatmul.mubr.msk.f32.vlgmr.msra.gmra.mrb[12].mxu1 %vm259_vm2, %v666_v14 }
 0x470   :  { %4625 = vmatprep.mubr.msk.f32.mxu1 %vm5130_vm1, %v5129_v41 }
 0x533   :  { %v5376_v15 = vpop.f32.mrb[6].mxu1 }
 0x534   :  { %v4607_v16 = vpop.f32.mrb[7].mxu1 }
 0x537   :  { %v5378_v17 = vpop.f32.mrb[8].mxu1 }
 0x538   :  { %v4612_v18 = vpop.f32.mrb[9].mxu1 }
 0x53e   :  { %v661_v19 = vpop.f32.mrb[10].mxu1 }
 0x53f   :  { %v4617_v20 = vpop.f32.mrb[11].mxu1  ;;  %v743_v21 = vsel %vm259_vm2, %v661_v19, -inf }
 0x540   :  { %744 = vmax.xlane.f32.xlu1 %v743_v21 }
 0x542   :  { %v739_v22 = vpop.f32.mrb[12].mxu1 }
 0x543   :  { %v4622_v23 = vpop.f32.mrb[13].mxu1  ;;  %v746_v24 = vsel %vm259_vm2, %v739_v22, -inf }
 0x544   :  { %747 = vmax.xlane.f32.xlu0 %v746_v24 }
 0x55a   :  { %841 = vrot.lane.b32.xlu0 %v5320_v46, %s5135_s17 }
 0x55e   :  { %1159 = vrot.lane.b32.xlu0 %v5320_v46, %s5136_s18 }
 0x5cd   :  { %v745_v25 = vpop.xlane.xlu1 %744 }
 0x5ce   :  { %v749_v26 = vsub.f32 %v661_v19, %v745_v25 }
 0x5d0   :  { %v751_v27 = vmul.f32 1.442695, %v749_v26 }
 0x5d1   :  { %v748_v28 = vpop.xlane.xlu0 %747 }
 0x5d2   :  { %5057 = vpow2.f32 %v751_v27  ;;  %v750_v29 = vsub.f32 %v739_v22, %v748_v28 }
 0x5d4   :  { %v753_v30 = vmul.f32 1.442695, %v750_v29 }
 0x5d5   :  { %v842_v43 = vpop.permute.xlu0 %841 }
 0x5d6   :  { %5059 = vpow2.f32 %v753_v30 }
 0x5d9   :  { %v1160_v58 = vpop.permute.xlu0 %1159 }
 0x5dc   :  { %v5058_v31 = vpop.eup %5057 }
 0x5dd   :  { %v755_v32 = vsel %vm259_vm2, %v5058_v31, 0.0 }
 0x5de   :  { %756 = vadd.xlane.f32.xlu1 %v755_v32 }
 0x5e0   :  { %v5060_v33 = vpop.eup %5059 }
 0x5e1   :  { %v758_v34 = vsel %vm259_vm2, %v5060_v33, 0.0 }
 0x5e2   :  { %759 = vadd.xlane.f32.xlu1 %v758_v34 }
 0x5f3   :  { %765 = vrot.lane.b32.xlu1 %v5316_v45, %s5135_s17 }
 0x5f7   :  { %1081 = vrot.lane.b32.xlu1 %v5316_v45, %s5136_s18 }
 0x5fb   :  { %1079 = vrot.lane.b32.xlu1 %v5327_v48, %s5137_s19 }
 0x5ff   :  { %1157 = vrot.lane.b32.xlu1 %v5335_v50, %s5137_s19 }
 0x66b   :  { %v757_v35 = vpop.xlane.xlu1 %756 }
 0x66c   :  { %5061 = vrcp.f32 %v757_v35 }
 0x66f   :  { %v760_v36 = vpop.xlane.xlu1 %759 }
 0x670   :  { %5063 = vrcp.f32 %v760_v36 }
 0x673   :  { %v766_v37 = vpop.permute.xlu1 %765 }
 0x674   :  { %4624 = vmatpush3.msra.mxu1 %v766_v37 }
 0x675   :  { %4628 = vmatprep.subr.mxu1 %v5129_v41 }
 0x676   :  { %v5062_v38 = vpop.eup %5061 }
 0x677   :  { %v763_v42 = vmul.f32 %v5062_v38, %v5058_v31  ;;  %v1082_v56 = vpop.permute.xlu1 %1081 }
 0x679   :  { %4626 = vmatmul.mubr.msk.f32.vlgmr.msra.gmra.mrb[14].mxu1 %vm259_vm2, %v763_v42 }
 0x67a   :  { %v5064_v44 = vpop.eup %5063  ;;  %4629 = vmatpush3.msra.mxu1 %v842_v43  ;;  %4630 = vmatprep.mubr.msk.f32.mxu1 %vm5130_vm1, %v5129_v41 }
 0x67b   :  { %v764_v47 = vmul.f32 %v5064_v44, %v5060_v33  ;;  %4633 = vmatprep.subr.mxu1 %v253_v49  ;;  %v1080_v57 = vpop.permute.xlu1 %1079 }
 0x67d   :  { %4631 = vmatmul.mubr.msk.f32.vlgmr.msra.gmra.mrb[16].mxu1 %vm259_vm2, %v764_v47 }
 0x67e   :  { %4634 = vmatpush3.msra.mxu1 %v253_v49 }
 0x67f   :  { %4638 = vmatprep.subr.mxu1 %v252_v51  ;;  %v1158_v59 = vpop.permute.xlu1 %1157 }
 0x74c   :  { %v837_v52 = vpop.f32.mrb[14].mxu1 }
 0x74d   :  { %v4627_v53 = vpop.f32.mrb[15].mxu1  ;;  %4635 = vmatprep.mubr.msk.f32.mxu1 %vm259_vm2, %v837_v52 }
 0x750   :  { %v913_v54 = vpop.f32.mrb[16].mxu1 }
 0x751   :  { %v4632_v55 = vpop.f32.mrb[17].mxu1  ;;  %4636 = vmatmul.mubr.msk.f32.vlgmr.msra.gmra.mrb[18].mxu1 %vm259_vm2, %v913_v54 }
 0x752   :  { %4639 = vmatpush3.msra.mxu1 %v252_v51  ;;  %4640 = vmatprep.mubr.msk.f32.mxu1 %vm259_vm2, %v5376_v15 }
 0x753   :  { %4643 = vmatprep.subr.mxu1 %v5129_v41 }
 0x759   :  { %4641 = vmatmul.mubr.msk.f32.vlgmr.msra.gmra.mrb[18].mxu1 %vm259_vm2, %v5378_v17 }
 0x75a   :  { %4644 = vmatpush3.xpose.msk.msra.mxu1 %vm259_vm2, %v1082_v56  ;;  %4645 = vmatprep.mubr.msk.f32.mxu1 %vm5130_vm1, %v5129_v41  ;;  %v255_v56 = vld [vmem:[%s5902_s6 + $0x18] sm:$0xff] }
 0x75b   :  { %4648 = vmatprep.subr.mxu1 %v5129_v41 }
 0x75d   :  { %4646 = vmatmul.mubr.msk.f32.vlgmr.msra.gmra.mrb[20].mxu1 %vm259_vm2, %v1080_v57 }
 0x75e   :  { %4649 = vmatpush3.xpose.msk.msra.mxu1 %vm259_vm2, %v1160_v58  ;;  %4650 = vmatprep.mubr.msk.f32.mxu1 %vm5130_vm1, %v5129_v41 }
 0x75f   :  { %4653 = vmatprep.subr.mxu1 %v5129_v41 }
 0x761   :  { %4651 = vmatmul.mubr.msk.f32.vlgmr.msra.gmra.mrb[22].mxu1 %vm259_vm2, %v1158_v59 }
 0x762   :  { %4655 = vmatprep.mubr.msk.f32.mxu1 %vm5130_vm1, %v5129_v41 }
 0x82c   :  { %v5426_v60 = vpop.f32.mrb[18].mxu1 }
 0x82d   :  { %v5428_v61 = vpop.f32.mrb[19].mxu1 }
 0x830   :  { %v1153_v62 = vpop.f32.mrb[20].mxu1 }
 0x831   :  { %v4647_v63 = vpop.f32.mrb[21].mxu1  ;;  %v1235_v0 = vsel %vm259_vm2, %v1153_v62, -inf }
 0x832   :  { %1236 = vmax.xlane.f32.xlu0 %v1235_v0 }
 0x834   :  { %v1231_v1 = vpop.f32.mrb[22].mxu1 }
 0x835   :  { %v4652_v2 = vpop.f32.mrb[23].mxu1  ;;  %v1238_v3 = vsel %vm259_vm2, %v1231_v1, -inf }
 0x836   :  { %1239 = vmax.xlane.f32.xlu1 %v1238_v3  ;;  %v4292_v2 = vld [vmem:[%s5903_s7] ss:$0 sm:$0xff] }
 0x847   :  { %1257 = vrot.lane.b32.xlu1 %v5316_v45, %s5138_s24 }
 0x84b   :  { %1494 = vrot.lane.b32.xlu1 %v5316_v45, %s5918_s0 }
 0x84f   :  { %1572 = vrot.lane.b32.xlu1 %v5320_v46, %s5918_s0 }
 0x853   :  { %1570 = vrot.lane.b32.xlu1 %v5335_v50, %s5916_s25  ;;  %v254_v50 = vld [vmem:[%s5902_s6 + $0x10] sm:$0xff] }
 0x854   :  { %4663 = vmatprep.subr.mxu0 %v254_v50 }
 0x855   :  { %4664 = vmatpush3.msra.mxu0 %v254_v50 }
 0x856   :  { %4673 = vmatprep.subr.mxu0 %v5129_v41 }
 0x8bf   :  { %v1237_v4 = vpop.xlane.xlu0 %1236 }
 0x8c0   :  { %v1241_v5 = vsub.f32 %v1153_v62, %v1237_v4 }
 0x8c2   :  { %v1243_v6 = vmul.f32 1.442695, %v1241_v5 }
 0x8c3   :  { %v1240_v7 = vpop.xlane.xlu1 %1239 }
 0x8c4   :  { %5065 = vpow2.f32 %v1243_v6  ;;  %v1242_v8 = vsub.f32 %v1231_v1, %v1240_v7 }
 0x8c6   :  { %v1245_v9 = vmul.f32 1.442695, %v1242_v8 }
 0x8c7   :  { %v1258_v10 = vpop.permute.xlu1 %1257 }
 0x8c8   :  { %5067 = vpow2.f32 %v1245_v9  ;;  %4654 = vmatpush3.msra.mxu1 %v1258_v10 }
 0x8c9   :  { %4658 = vmatprep.subr.mxu1 %v5129_v41 }
 0x8cb   :  { %v1495_v21 = vpop.permute.xlu1 %1494 }
 0x8ce   :  { %v5066_v11 = vpop.eup %5065 }
 0x8cf   :  { %v1247_v12 = vsel %vm259_vm2, %v5066_v11, 0.0  ;;  %v1573_v25 = vpop.permute.xlu1 %1572 }
 0x8d0   :  { %1248 = vadd.xlane.f32.xlu0 %v1247_v12 }
 0x8d2   :  { %v5068_v13 = vpop.eup %5067 }
 0x8d3   :  { %v1250_v14 = vsel %vm259_vm2, %v5068_v13, 0.0  ;;  %v1571_v28 = vpop.permute.xlu1 %1570 }
 0x8d4   :  { %1251 = vadd.xlane.f32.xlu0 %v1250_v14 }
 0x8ea   :  { %1333 = vrot.lane.b32.xlu0 %v5320_v46, %s5138_s24 }
 0x8ee   :  { %1492 = vrot.lane.b32.xlu0 %v5327_v48, %s5916_s25 }
 0x95d   :  { %v1249_v15 = vpop.xlane.xlu0 %1248 }
 0x95e   :  { %5069 = vrcp.f32 %v1249_v15 }
 0x961   :  { %v1252_v16 = vpop.xlane.xlu0 %1251 }
 0x962   :  { %5071 = vrcp.f32 %v1252_v16 }
 0x965   :  { %v1334_v19 = vpop.permute.xlu0 %1333 }
 0x968   :  { %v5070_v17 = vpop.eup %5069 }
 0x969   :  { %v1255_v18 = vmul.f32 %v5070_v17, %v5066_v11  ;;  %v1493_v22 = vpop.permute.xlu0 %1492  ;;  %v1961_v17 = vld [vmem:[%s5904_s8] sm:$0xff] }
 0x96b   :  { %4656 = vmatmul.mubr.msk.f32.vlgmr.msra.gmra.mrb[24].mxu1 %vm259_vm2, %v1255_v18  ;;  %v1962_v18 = vld [vmem:[%s5904_s8 + $0x8] sm:$0xff] }
 0x96c   :  { %v5072_v20 = vpop.eup %5071  ;;  %4659 = vmatpush3.msra.mxu1 %v1334_v19  ;;  %4660 = vmatprep.mubr.msk.f32.mxu1 %vm5130_vm1, %v5129_v41  ;;  %v4936_v19 = vpack.c.bf16 %v1962_v18, %v1961_v17 }
 0x96d   :  { %v1256_v48 = vmul.f32 %v5072_v20, %v5068_v13  ;;  %4668 = vmatprep.subr.mxu1 %v5129_v41  ;;  %v1963_v20 = vld [vmem:[%s5904_s8 + $0x10] sm:$0xff] }
 0x96f   :  { %4661 = vmatmul.mubr.msk.f32.vlgmr.msra.gmra.mrb[26].mxu1 %vm259_vm2, %v1256_v48  ;;  %v1964_v48 = vld [vmem:[%s5904_s8 + $0x18] sm:$0xff] }
 0x970   :  { %4670 = vmatprep.mubr.msk.f32.mxu1 %vm5130_vm1, %v5129_v41 }
 0x973   :  { %4669 = vmatpush3.xpose.msk.msra.mxu1 %vm259_vm2, %v1495_v21  ;;  %v4940_v21 = vpack.c.bf16 %v1964_v48, %v1963_v20 }
 0x974   :  { %4678 = vmatprep.subr.mxu1 %v5129_v41 }
 0x976   :  { %4671 = vmatmul.mubr.msk.f32.vlgmr.msra.gmra.mrb[28].mxu1 %vm259_vm2, %v1493_v22  ;;  %v2055_v22 = vld [vmem:[%s5905_s10] sm:$0xff] }
 0x977   :  { %4680 = vmatprep.mubr.msk.f32.mxu1 %vm5130_vm1, %v5129_v41 }
 0xa3e   :  { %v1329_v23 = vpop.f32.mrb[24].mxu1 }
 0xa3f   :  { %v4657_v24 = vpop.f32.mrb[25].mxu1  ;;  %4665 = vmatprep.mubr.msk.f32.mxu0 %vm259_vm2, %v1329_v23  ;;  %v2056_v23 = vld [vmem:[%s5905_s10 + $0x8] sm:$0xff] }
 0xa40   :  { %v2057_v24 = vld [vmem:[%s5905_s10 + $0x10] sm:$0xff] }
 0xa42   :  { %v1405_v26 = vpop.f32.mrb[26].mxu1 }
 0xa43   :  { %v4662_v27 = vpop.f32.mrb[27].mxu1  ;;  %4666 = vmatmul.mubr.msk.f32.vlgmr.msra.gmra.mrb[2].mxu0 %vm259_vm2, %v1405_v26  ;;  %v2058_v26 = vld [vmem:[%s5905_s10 + $0x18] sm:$0xff] }
 0xa44   :  { %4674 = vmatpush3.xpose.msk.msra.mxu0 %vm259_vm2, %v1573_v25  ;;  %4675 = vmatprep.mubr.msk.f32.mxu0 %vm5130_vm1, %v5129_v41  ;;  %v4944_v25 = vpack.c.bf16 %v2056_v23, %v2055_v22  ;;  %v4948_v27 = vpack.c.bf16 %v2058_v26, %v2057_v24  ;;  %v4302_v26 = vld [vmem:[%s5898_s4 + $0x28] sm:$0xff] }
 0xa45   :  { %4683 = vmatprep.subr.mxu0 %v5129_v41 }
 0xa47   :  { %4676 = vmatmul.mubr.msk.f32.vlgmr.msra.gmra.mrb[4].mxu0 %vm259_vm2, %v1571_v28  ;;  %v2059_v28 = vld [vmem:[%s5905_s10 + $0x20] sm:$0xff] }
 0xa48   :  { %4685 = vmatprep.mubr.msk.f32.mxu0 %vm5130_vm1, %v5129_v41 }
 0xa49   :  { %v1566_v29 = vpop.f32.mrb[28].mxu1 }
 0xa4a   :  { %v4672_v30 = vpop.f32.mrb[29].mxu1  ;;  %v1648_v31 = vsel %vm259_vm2, %v1566_v29, -inf }
 0xa4b   :  { %1649 = vmax.xlane.f32.xlu0 %v1648_v31  ;;  %v2061_v31 = vld [vmem:[%s5905_s10 + $0x30] sm:$0xff] }
 0xad8   :  { %v1650_v32 = vpop.xlane.xlu0 %1649 }
 0xad9   :  { %v1654_v33 = vsub.f32 %v1566_v29, %v1650_v32  ;;  %v2060_v29 = vld [vmem:[%s5905_s10 + $0x28] sm:$0xff]  ;;  %v2062_v32 = vld [vmem:[%s5905_s10 + $0x38] sm:$0xff] }
 0xada   :  { %v4952_v30 = vpack.c.bf16 %v2060_v29, %v2059_v28  ;;  %v4303_v28 = vld [vmem:[%s5898_s4 + $0x30] sm:$0xff]  ;;  %v4304_v29 = vld [vmem:[%s5898_s4 + $0x38] sm:$0xff] }
 0xadb   :  { %v1656_v34 = vmul.f32 1.442695, %v1654_v33  ;;  %v4956_v33 = vpack.c.bf16 %v2062_v32, %v2061_v31 }
 0xadd   :  { %5073 = vpow2.f32 %v1656_v34  ;;  %v2063_v34 = vld [vmem:[%s5905_s10 + $0x40] sm:$0xff] }
 0xae7   :  { %v5074_v35 = vpop.eup %5073 }
 0xae8   :  { %v1660_v36 = vsel %vm259_vm2, %v5074_v35, 0.0 }
 0xae9   :  { %1661 = vadd.xlane.f32.xlu0 %v1660_v36 }
 0xb1a   :  { %v1644_v37 = vpop.f32.mrb[4].mxu0 }
 0xb1b   :  { %v4677_v38 = vpop.f32.mrb[5].mxu0  ;;  %v1651_v42 = vsel %vm259_vm2, %v1644_v37, -inf }
 0xb1c   :  { %1652 = vmax.xlane.f32.xlu1 %v1651_v42  ;;  %v2066_v38 = vld [vmem:[%s5905_s10 + $0x58] sm:$0xff] }
 0xb2d   :  { %1670 = vrot.lane.b32.xlu1 %v5316_v45, %s5914_s2 }
 0xb76   :  { %v1662_v43 = vpop.xlane.xlu0 %1661 }
 0xb77   :  { %5075 = vrcp.f32 %v1662_v43  ;;  %v2067_v43 = vld [vmem:[%s5905_s10 + $0x60] sm:$0xff] }
 0xb81   :  { %v5076_v47 = vpop.eup %5075 }
 0xb82   :  { %v1668_v52 = vmul.f32 %v5076_v47, %v5074_v35  ;;  %v2064_v35 = vld [vmem:[%s5905_s10 + $0x48] sm:$0xff] }
 0xb83   :  { %v4960_v36 = vpack.c.bf16 %v2064_v35, %v2063_v34 }
 0xba9   :  { %v1653_v44 = vpop.xlane.xlu1 %1652 }
 0xbaa   :  { %v1655_v49 = vsub.f32 %v1644_v37, %v1653_v44  ;;  %v2065_v37 = vld [vmem:[%s5905_s10 + $0x50] sm:$0xff]  ;;  %v2068_v44 = vld [vmem:[%s5905_s10 + $0x68] sm:$0xff] }
 0xbab   :  { %v4964_v42 = vpack.c.bf16 %v2066_v38, %v2065_v37  ;;  %v4968_v47 = vpack.c.bf16 %v2068_v44, %v2067_v43  ;;  %v4299_v38 = vld [vmem:[%s5910_s14] ss:$0 sm:$0xff] }
 0xbac   :  { %v1658_v51 = vmul.f32 1.442695, %v1655_v49 }
 0xbad   :  { %v1671_v53 = vpop.permute.xlu1 %1670 }
 0xbae   :  { %5077 = vpow2.f32 %v1658_v51  ;;  %4679 = vmatpush3.msra.mxu1 %v1671_v53 }
 0xbaf   :  { %4681 = vmatmul.mubr.msk.f32.vlgmr.msra.gmra.mrb[30].mxu1 %vm259_vm2, %v1668_v52  ;;  %4937 = vmatprep.subr.bf16.mxu1 %v4936_v19 }
 0xbb0   :  { %4939 = vmatpush3.bf16.msra.mxu1 %v4936_v19 }
 0xbb1   :  { %4941 = vmatprep.subr.bf16.mxu1 %v4940_v21 }
 0xbb4   :  { %4943 = vmatpush3.bf16.msra.mxu1 %v4940_v21 }
 0xbb8   :  { %v5078_v54 = vpop.eup %5077 }
 0xbb9   :  { %v1663_v55 = vsel %vm259_vm2, %v5078_v54, 0.0 }
 0xbba   :  { %1664 = vadd.xlane.f32.xlu0 %v1663_v55 }
 0xbd0   :  { %1746 = vrot.lane.b32.xlu0 %v5320_v46, %s5914_s2 }
 0xc47   :  { %v1665_v45 = vpop.xlane.xlu0 %1664 }
 0xc48   :  { %5079 = vrcp.f32 %v1665_v45 }
 0xc4b   :  { %v1747_v57 = vpop.permute.xlu0 %1746 }
 0xc4c   :  { %4684 = vmatpush3.msra.mxu0 %v1747_v57 }
 0xc4d   :  { %4688 = vmatprep.subr.mxu0 %v255_v56 }
 0xc52   :  { %v5080_v58 = vpop.eup %5079 }
 0xc53   :  { %v1669_v59 = vmul.f32 %v5080_v58, %v5078_v54 }
 0xc55   :  { %4686 = vmatmul.mubr.msk.f32.vlgmr.msra.gmra.mrb[6].mxu0 %vm259_vm2, %v1669_v59 }
 0xc56   :  { %4689 = vmatpush3.msra.mxu0 %v255_v56  ;;  %v4293_v56 = vld [vmem:[%s5906_s12] ss:$0 sm:$0xff] }
 0xc57   :  { %4945 = vmatprep.subr.bf16.mxu0 %v4944_v25 }
 0xc82   :  { %v1742_v62 = vpop.f32.mrb[30].mxu1 }
 0xc83   :  { %v4682_v63 = vpop.f32.mrb[31].mxu1  ;;  %4690 = vmatprep.mubr.msk.f32.mxu0 %vm259_vm2, %v1742_v62  ;;  %v4294_v62 = vld [vmem:[%s5907_s13] ss:$0 sm:$0xff] }
 0xd28   :  { %v1818_v0 = vpop.f32.mrb[6].mxu0 }
 0xd29   :  { %v4687_v46 = vpop.f32.mrb[7].mxu0  ;;  %4691 = vmatmul.mubr.msk.f32.vlgmr.msra.gmra.mrb[2].mxu0 %vm259_vm2, %v1818_v0 }
 0xd2a   :  { %4947 = vmatpush3.bf16.msra.mxu0 %v4944_v25  ;;  %v4301_v25 = vld [vmem:[%s5898_s4 + $0x20] sm:$0xff] }
 0xd2b   :  { %4949 = vmatprep.subr.bf16.mxu0 %v4948_v27 }
 0xd2e   :  { %4951 = vmatpush3.bf16.msra.mxu0 %v4948_v27  ;;  %v4976_v27 = vpack.c.bf16 %v4302_v26, %v4301_v25 }
 0xd2f   :  { %4953 = vmatprep.subr.bf16.mxu0 %v4952_v30 }
 0xd30   :  { %4977 = vmatprep.subr.bf16.mxu1 %v4976_v27 }
 0xd32   :  { %4955 = vmatpush3.bf16.msra.mxu0 %v4952_v30  ;;  %v4980_v30 = vpack.c.bf16 %v4304_v29, %v4303_v28 }
 0xd33   :  { %4957 = vmatprep.subr.bf16.mxu0 %v4956_v33 }
 0xd36   :  { %4959 = vmatpush3.bf16.msra.mxu0 %v4956_v33 }
 0xd37   :  { %4961 = vmatprep.subr.bf16.mxu0 %v4960_v36 }
 0xd3a   :  { %4963 = vmatpush3.bf16.msra.mxu0 %v4960_v36 }
 0xd3b   :  { %4965 = vmatprep.subr.bf16.mxu0 %v4964_v42 }
 0xd3e   :  { %4967 = vmatpush3.bf16.msra.mxu0 %v4964_v42 }
 0xd3f   :  { %4969 = vmatprep.subr.bf16.mxu0 %v4968_v47 }
 0xd42   :  { %4971 = vmatpush3.bf16.msra.mxu0 %v4968_v47  ;;  %v4300_v47 = vld [vmem:[%s5911_s15] ss:$0 sm:$0xff] }
 0xdfc   :  { %v4692_v1 = vpop.f32.mrb[2].mxu0 }
 0xdfd   :  { %v5024_v3 = vadd.f32 %v4692_v1, %v5426_v60  ;;  %v1894_v4 = vpop.f32.mrb[3].mxu0 }
 0xdfe   :  { %v5025_v5 = vadd.f32 %v1894_v4, %v5428_v61 }
 0xdff   :  { %v1913_v6 = vadd.f32 %v5024_v3, %v4292_v2  ;;  %v2070_v3 = vld [vmem:[%s5905_s10 + $0x78] sm:$0xff] }
 0xe00   :  { %v1912_v7 = vadd.f32 %v5025_v5, %v4292_v2  ;;  %v2069_v2 = vld [vmem:[%s5905_s10 + $0x70] sm:$0xff]  ;;  %v4295_v5 = vld [vmem:[%s5908_s9] ss:$0 sm:$0xff] }
 0xe01   :  { %v1915_v8 = vadd.f32 %v1913_v6, %v5304_v40  ;;  %v4972_v4 = vpack.c.bf16 %v2070_v3, %v2069_v2 }
 0xe02   :  { %v1914_v9 = vadd.f32 %v1912_v7, %v5302_v39 }
 0xe03   :  { %v1921_v10 = vsel %vm168_vm0, %v1915_v8, 0.0  ;;  %4973 = vmatprep.subr.bf16.mxu0 %v4972_v4 }
 0xe04   :  { %1922 = vadd.xlane.f32.xlu0 %v1921_v10  ;;  %v1918_v11 = vsel %vm168_vm0, %v1914_v9, 0.0  ;;  %4975 = vmatpush3.bf16.msra.mxu0 %v4972_v4 }
 0xe05   :  { %1919 = vadd.xlane.f32.xlu1 %v1918_v11  ;;  %4780 = vmatprep.subr.mxu0 %v5129_v41 }
 0xe91   :  { %v1923_v12 = vpop.xlane.xlu0 %1922 }
 0xe92   :  { %v1926_v13 = vmul.f32 0.03125, %v1923_v12  ;;  %v1920_v14 = vpop.xlane.xlu1 %1919  ;;  %v4298_v12 = vld [vmem:[%s5909_s11] ss:$0 sm:$0xff] }
 0xe93   :  { %v1925_v50 = vmul.f32 0.03125, %v1920_v14 }
 0xe94   :  { %v5496_v60 = vsub.f32 %v1915_v8, %v1926_v13 }
 0xe95   :  { %v5498_v15 = vsub.f32 %v1914_v9, %v1925_v50 }
 0xe96   :  { %v1930_v61 = vmul.f32 %v5496_v60, %v5496_v60 }
 0xe97   :  { %v1929_v39 = vmul.f32 %v5498_v15, %v5498_v15 }
 0xe98   :  { %v1934_v40 = vsel %vm168_vm0, %v1930_v61, 0.0 }
 0xe99   :  { %1935 = vadd.xlane.f32.xlu0 %v1934_v40  ;;  %v1931_v16 = vsel %vm168_vm0, %v1929_v39, 0.0 }
 0xe9a   :  { %1932 = vadd.xlane.f32.xlu1 %v1931_v16 }
 0xf26   :  { %v1936_v49 = vpop.xlane.xlu0 %1935 }
 0xf27   :  { %v1938_v51 = vmul.f32 0.03125, %v1936_v49  ;;  %v1933_v52 = vpop.xlane.xlu1 %1932 }
 0xf28   :  { %v1937_v53 = vmul.f32 0.03125, %v1933_v52 }
 0xf29   :  { %v1940_v54 = vadd.f32 1e-05, %v1938_v51 }
 0xf2a   :  { %v1939_v55 = vadd.f32 1e-05, %v1937_v53 }
 0xf2b   :  { %5081 = vrsqrt.f32 %v1940_v54  ;;  %v4306_v54 = vld [vmem:[%s5901_s5 + $0x1] ss:$0 sm:$0xff]  ;;  %s5922_s5 = smov 72  }
 0xf2c   :  { %5083 = vrsqrt.f32 %v1939_v55 }
 0xf35   :  { %v5082_v45 = vpop.eup %5081 }
 0xf36   :  { %v5084_v57 = vpop.eup %5083  ;;  %v1944_v58 = vmul.f32 %v5082_v45, %v5496_v60 }
 0xf37   :  { %v1943_v59 = vmul.f32 %v5084_v57, %v5498_v15 }
 0xf38   :  { %v1952_v63 = vmul.f32 %v4293_v56, %v1944_v58 }
 0xf39   :  { %v1951_v0 = vmul.f32 %v4293_v56, %v1943_v59 }
 0xf3a   :  { %v1960_v1 = vadd.f32 %v4294_v62, %v1952_v63 }
 0xf3b   :  { %v1959_v46 = vadd.f32 %v4294_v62, %v1951_v0 }
 0xf3d   :  { %4701 = vmatprep.mubr.msk.f32.mxu1 %vm168_vm0, %v1959_v46 }
 0xf3e   :  { %4702 = vmatmul.mubr.msk.f32.vlgmr.msra.gmra.mrb[32].mxu1 %vm168_vm0, %v1960_v1 }
 0xf3f   :  { %4979 = vmatpush3.bf16.msra.mxu1 %v4976_v27 }
 0xf40   :  { %4981 = vmatprep.subr.bf16.mxu1 %v4980_v30 }
 0xf43   :  { %4983 = vmatpush3.bf16.msra.mxu1 %v4980_v30 }
 0xf44   :  { %4750 = vmatprep.subr.mxu1 %v5129_v41 }
0x1011   :  { %v4703_v6 = vpop.f32.mrb[32].mxu1 }
0x1012   :  { %v2050_v7 = vadd.f32 %v4703_v6, %v4295_v5  ;;  %v2044_v8 = vpop.f32.mrb[33].mxu1 }
0x1013   :  { %v2045_v9 = vadd.f32 %v4295_v5, %v2044_v8 }
0x1014   :  { %v2054_v11 = vmax.f32 %v2050_v7, 0.0 }
0x1015   :  { %v2053_v10 = vmax.f32 %v2045_v9, 0.0 }
0x1017   :  { %4736 = vmatprep.mubr.f32.mxu0 %v2053_v10 }
0x1018   :  { %4737 = vmatmul.mubr.f32.vlgmr.msra.gmra.mrb[8].mxu0 %v2054_v11 }
0x1019   :  { %4782 = vmatprep.mubr.msk.f32.mxu0 %vm5130_vm1, %v5129_v41 }
0x10eb   :  { %v4738_v13 = vpop.f32.mrb[8].mxu0 }
0x10ec   :  { %v2150_v14 = vadd.f32 %v4738_v13, %v4298_v12  ;;  %v2144_v50 = vpop.f32.mrb[9].mxu0 }
0x10ed   :  { %v2145_v60 = vadd.f32 %v4298_v12, %v2144_v50 }
0x10ee   :  { %v2154_v15 = vadd.f32 %v2150_v14, %v1960_v1 }
0x10ef   :  { %v2153_v61 = vadd.f32 %v2145_v60, %v1959_v46 }
0x10f0   :  { %v2160_v39 = vsel %vm168_vm0, %v2154_v15, 0.0 }
0x10f1   :  { %2161 = vadd.xlane.f32.xlu0 %v2160_v39  ;;  %v2157_v40 = vsel %vm168_vm0, %v2153_v61, 0.0 }
0x10f2   :  { %2158 = vadd.xlane.f32.xlu1 %v2157_v40 }
0x117e   :  { %v2162_v16 = vpop.xlane.xlu0 %2161 }
0x117f   :  { %v2164_v17 = vmul.f32 0.03125, %v2162_v16  ;;  %v2159_v18 = vpop.xlane.xlu1 %2158 }
0x1180   :  { %v2163_v19 = vmul.f32 0.03125, %v2159_v18 }
0x1181   :  { %v2166_v20 = vsub.f32 %v2154_v15, %v2164_v17 }
0x1182   :  { %v2165_v48 = vsub.f32 %v2153_v61, %v2163_v19 }
0x1183   :  { %v2168_v21 = vmul.f32 %v2166_v20, %v2166_v20 }
0x1184   :  { %v2167_v22 = vmul.f32 %v2165_v48, %v2165_v48 }
0x1185   :  { %v2172_v23 = vsel %vm168_vm0, %v2168_v21, 0.0 }
0x1186   :  { %2173 = vadd.xlane.f32.xlu0 %v2172_v23  ;;  %v2169_v24 = vsel %vm168_vm0, %v2167_v22, 0.0 }
0x1187   :  { %2170 = vadd.xlane.f32.xlu1 %v2169_v24 }
0x1213   :  { %v2174_v31 = vpop.xlane.xlu0 %2173 }
0x1214   :  { %v2176_v32 = vmul.f32 0.03125, %v2174_v31  ;;  %v2171_v33 = vpop.xlane.xlu1 %2170 }
0x1215   :  { %v2175_v34 = vmul.f32 0.03125, %v2171_v33 }
0x1216   :  { %v2178_v35 = vadd.f32 1e-05, %v2176_v32 }
0x1217   :  { %v2177_v36 = vadd.f32 1e-05, %v2175_v34 }
0x1218   :  { %5085 = vrsqrt.f32 %v2178_v35 }
0x1219   :  { %5087 = vrsqrt.f32 %v2177_v36 }
0x1222   :  { %v5086_v37 = vpop.eup %5085 }
0x1223   :  { %v5088_v42 = vpop.eup %5087  ;;  %v2182_v43 = vmul.f32 %v5086_v37, %v2166_v20 }
0x1224   :  { %v2181_v44 = vmul.f32 %v5088_v42, %v2165_v48 }
0x1225   :  { %v2190_v49 = vmul.f32 %v4299_v38, %v2182_v43 }
0x1226   :  { %v2189_v51 = vmul.f32 %v4299_v38, %v2181_v44 }
0x1227   :  { %v5610_v53 = vadd.f32 %v4300_v47, %v2190_v49 }
0x1228   :  { %v5608_v52 = vadd.f32 %v4300_v47, %v2189_v51 }
0x122a   :  { %4747 = vmatprep.mubr.msk.f32.mxu1 %vm168_vm0, %v5608_v52 }
0x122b   :  { %4748 = vmatmul.mubr.msk.f32.vlgmr.msra.gmra.mrb[34].mxu1 %vm168_vm0, %v5610_v53 }
0x122c   :  { %4752 = vmatprep.mubr.msk.f32.mxu1 %vm5130_vm1, %v5129_v41 }
0x12fe   :  { %v4749_v55 = vpop.f32.mrb[34].mxu1 }
0x12ff   :  { %v5621_v45 = vadd.f32 %v4749_v55, %v4306_v54  ;;  %v2284_v56 = vpop.f32.mrb[35].mxu1 }
0x1300   :  { %v5623_v57 = vadd.f32 %v4306_v54, %v2284_v56 }
0x1301   :  { %2379 = vrot.lane.b32.xlu0 %v5621_v45, %s5131_s28  ;;  %v5640_v63 = vmul.f32 0.35355338, %v5621_v45 }
0x1302   :  { %2301 = vrot.lane.b32.xlu1 %v5623_v57, %s5131_s28  ;;  %v5631_v59 = vmul.f32 0.35355338, %v5623_v57  ;;  %s5923_s28 = smov 104  }
0x1373   :  { %v2380_v62 = vpop.permute.xlu0 %2379 }
0x1374   :  { %v2302_v58 = vpop.permute.xlu1 %2301 }
0x1375   :  { %4751 = vmatpush3.xpose.msk.msra.mxu1 %vm259_vm2, %v2302_v58 }
0x1376   :  { %4755 = vmatprep.subr.mxu1 %v5129_v41 }
0x1378   :  { %4753 = vmatmul.mubr.msk.f32.vlgmr.msra.gmra.mrb[36].mxu1 %vm259_vm2, %v5631_v59 }
0x1379   :  { %4756 = vmatpush3.xpose.msk.msra.mxu1 %vm259_vm2, %v2380_v62  ;;  %4757 = vmatprep.mubr.msk.f32.mxu1 %vm5130_vm1, %v5129_v41 }
0x137a   :  { %4760 = vmatprep.subr.mxu1 %v5129_v41 }
0x137c   :  { %4758 = vmatmul.mubr.msk.f32.vlgmr.msra.gmra.mrb[38].mxu1 %vm259_vm2, %v5640_v63 }
0x137d   :  { %4762 = vmatprep.mubr.msk.f32.mxu1 %vm5130_vm1, %v5129_v41 }
0x144b   :  { %v2374_v0 = vpop.f32.mrb[36].mxu1 }
0x144c   :  { %v4754_v46 = vpop.f32.mrb[37].mxu1  ;;  %v2456_v1 = vsel %vm259_vm2, %v2374_v0, -inf }
0x144d   :  { %2457 = vmax.xlane.f32.xlu1 %v2456_v1 }
0x144f   :  { %v2452_v2 = vpop.f32.mrb[38].mxu1 }
0x1450   :  { %v4759_v3 = vpop.f32.mrb[39].mxu1  ;;  %v2459_v4 = vsel %vm259_vm2, %v2452_v2, -inf }
0x1451   :  { %2460 = vmax.xlane.f32.xlu0 %v2459_v4 }
0x145e   :  { %2478 = vrot.lane.b32.xlu1 %v5623_v57, %s5132_s29 }
0x14da   :  { %v2458_v5 = vpop.xlane.xlu1 %2457 }
0x14db   :  { %v2462_v6 = vsub.f32 %v2374_v0, %v2458_v5 }
0x14dd   :  { %v2464_v7 = vmul.f32 1.442695, %v2462_v6 }
0x14de   :  { %v2479_v8 = vpop.permute.xlu1 %2478  ;;  %v2461_v9 = vpop.xlane.xlu0 %2460 }
0x14df   :  { %5089 = vpow2.f32 %v2464_v7  ;;  %v2463_v10 = vsub.f32 %v2452_v2, %v2461_v9  ;;  %4761 = vmatpush3.msra.mxu1 %v2479_v8 }
0x14e0   :  { %4765 = vmatprep.subr.mxu1 %v5129_v41 }
0x14e1   :  { %v2466_v11 = vmul.f32 1.442695, %v2463_v10  ;;  %v4310_v10 = vld [vmem:[%s5902_s6 + $0x28] sm:$0xff] }
0x14e3   :  { %5091 = vpow2.f32 %v2466_v11  ;;  %v4309_v11 = vld [vmem:[%s5902_s6 + $0x20] sm:$0xff] }
0x14e9   :  { %v5090_v12 = vpop.eup %5089 }
0x14ea   :  { %v2468_v13 = vsel %vm259_vm2, %v5090_v12, 0.0 }
0x14eb   :  { %2469 = vadd.xlane.f32.xlu1 %v2468_v13 }
0x14ed   :  { %v5092_v14 = vpop.eup %5091 }
0x14ee   :  { %v2471_v50 = vsel %vm259_vm2, %v5092_v14, 0.0 }
0x14ef   :  { %2472 = vadd.xlane.f32.xlu0 %v2471_v50 }
0x14fc   :  { %2632 = vrot.lane.b32.xlu1 %v5623_v57, %s5133_s30 }
0x1500   :  { %2630 = vrot.lane.b32.xlu1 %v5631_v59, %s5134_s1 }
0x1504   :  { %2708 = vrot.lane.b32.xlu1 %v5640_v63, %s5134_s1 }
0x1505   :  { %2554 = vrot.lane.b32.xlu0 %v5621_v45, %s5132_s29 }
0x1508   :  { %3124 = vrot.lane.b32.xlu1 %v5623_v57, %s5136_s18 }
0x1509   :  { %2710 = vrot.lane.b32.xlu0 %v5621_v45, %s5133_s30 }
0x1578   :  { %v2470_v60 = vpop.xlane.xlu1 %2469 }
0x1579   :  { %5093 = vrcp.f32 %v2470_v60 }
0x157c   :  { %v2473_v15 = vpop.xlane.xlu0 %2472  ;;  %v2633_v17 = vpop.permute.xlu1 %2632 }
0x157d   :  { %5095 = vrcp.f32 %v2473_v15 }
0x1580   :  { %v2555_v40 = vpop.permute.xlu0 %2554  ;;  %v2631_v19 = vpop.permute.xlu1 %2630 }
0x1583   :  { %v5094_v61 = vpop.eup %5093 }
0x1584   :  { %v2476_v39 = vmul.f32 %v5094_v61, %v5090_v12  ;;  %v2711_v20 = vpop.permute.xlu0 %2710  ;;  %v2709_v48 = vpop.permute.xlu1 %2708 }
0x1586   :  { %4763 = vmatmul.mubr.msk.f32.vlgmr.msra.gmra.mrb[40].mxu1 %vm259_vm2, %v2476_v39 }
0x1587   :  { %v5096_v16 = vpop.eup %5095  ;;  %4766 = vmatpush3.msra.mxu1 %v2555_v40  ;;  %4767 = vmatprep.mubr.msk.f32.mxu1 %vm5130_vm1, %v5129_v41 }
0x1588   :  { %v2477_v18 = vmul.f32 %v5096_v16, %v5092_v14  ;;  %4770 = vmatprep.subr.mxu1 %v5129_v41  ;;  %v3125_v37 = vpop.permute.xlu1 %3124 }
0x158a   :  { %4768 = vmatmul.mubr.msk.f32.vlgmr.msra.gmra.mrb[42].mxu1 %vm259_vm2, %v2477_v18 }
0x158b   :  { %4772 = vmatprep.mubr.msk.f32.mxu1 %vm5130_vm1, %v5129_v41 }
0x158e   :  { %4771 = vmatpush3.xpose.msk.msra.mxu1 %vm259_vm2, %v2633_v17 }
0x158f   :  { %4775 = vmatprep.subr.mxu1 %v5129_v41 }
0x1591   :  { %4773 = vmatmul.mubr.msk.f32.vlgmr.msra.gmra.mrb[44].mxu1 %vm259_vm2, %v2631_v19 }
0x1592   :  { %4776 = vmatpush3.xpose.msk.msra.mxu1 %vm259_vm2, %v2711_v20  ;;  %4777 = vmatprep.mubr.msk.f32.mxu1 %vm5130_vm1, %v5129_v41  ;;  %v4311_v20 = vld [vmem:[%s5902_s6 + $0x30] sm:$0xff] }
0x1593   :  { %4785 = vmatprep.subr.mxu1 %v5129_v41 }
0x1595   :  { %4778 = vmatmul.mubr.msk.f32.vlgmr.msra.gmra.mrb[46].mxu1 %vm259_vm2, %v2709_v48 }
0x1596   :  { %4787 = vmatprep.mubr.msk.f32.mxu1 %vm5130_vm1, %v5129_v41 }
0x1659   :  { %v5683_v21 = vpop.f32.mrb[40].mxu1 }
0x165a   :  { %v4764_v22 = vpop.f32.mrb[41].mxu1 }
0x165d   :  { %v5685_v23 = vpop.f32.mrb[42].mxu1 }
0x165e   :  { %v4769_v24 = vpop.f32.mrb[43].mxu1 }
0x1664   :  { %v2704_v25 = vpop.f32.mrb[44].mxu1 }
0x1665   :  { %v4774_v26 = vpop.f32.mrb[45].mxu1  ;;  %v2786_v36 = vsel %vm259_vm2, %v2704_v25, -inf }
0x1668   :  { %v2782_v27 = vpop.f32.mrb[46].mxu1 }
0x1669   :  { %v4779_v28 = vpop.f32.mrb[47].mxu1  ;;  %v2789_v29 = vsel %vm259_vm2, %v2782_v27, -inf }
0x166a   :  { %2790 = vmax.xlane.f32.xlu0 %v2789_v29 }
0x1680   :  { %2884 = vrot.lane.b32.xlu0 %v5621_v45, %s5135_s17 }
0x1684   :  { %3122 = vrot.lane.b32.xlu0 %v5631_v59, %s5137_s19 }
0x1688   :  { %3200 = vrot.lane.b32.xlu0 %v5640_v63, %s5137_s19 }
0x16f7   :  { %v2791_v30 = vpop.xlane.xlu0 %2790 }
0x16f8   :  { %v2793_v31 = vsub.f32 %v2782_v27, %v2791_v30 }
0x16fa   :  { %v2796_v32 = vmul.f32 1.442695, %v2793_v31 }
0x16fb   :  { %v2885_v33 = vpop.permute.xlu0 %2884 }
0x16fc   :  { %5097 = vpow2.f32 %v2796_v32  ;;  %4786 = vmatpush3.msra.mxu1 %v2885_v33 }
0x16fd   :  { %4800 = vmatprep.subr.mxu1 %v5129_v41 }
0x16ff   :  { %v3123_v44 = vpop.permute.xlu0 %3122 }
0x1703   :  { %v3201_v49 = vpop.permute.xlu0 %3200 }
0x1706   :  { %v5098_v34 = vpop.eup %5097 }
0x1707   :  { %v2801_v35 = vsel %vm259_vm2, %v5098_v34, 0.0 }
0x1708   :  { %2802 = vadd.xlane.f32.xlu1 %v2801_v35 }
0x1719   :  { %3202 = vrot.lane.b32.xlu1 %v5621_v45, %s5136_s18 }
0x173d   :  { %2787 = vmax.xlane.f32.xlu1 %v2786_v36 }
0x1795   :  { %v2803_v38 = vpop.xlane.xlu1 %2802 }
0x1796   :  { %5099 = vrcp.f32 %v2803_v38 }
0x1799   :  { %v3203_v47 = vpop.permute.xlu1 %3202 }
0x17a0   :  { %v5100_v42 = vpop.eup %5099 }
0x17a1   :  { %v2807_v43 = vmul.f32 %v5100_v42, %v5098_v34 }
0x17a3   :  { %4788 = vmatmul.mubr.msk.f32.vlgmr.msra.gmra.mrb[48].mxu1 %vm259_vm2, %v2807_v43 }
0x17a4   :  { %4801 = vmatpush3.xpose.msk.msra.mxu1 %vm259_vm2, %v3125_v37  ;;  %4802 = vmatprep.mubr.msk.f32.mxu1 %vm5130_vm1, %v5129_v41 }
0x17a5   :  { %4805 = vmatprep.subr.mxu1 %v5129_v41 }
0x17a7   :  { %4803 = vmatmul.mubr.msk.f32.vlgmr.msra.gmra.mrb[50].mxu1 %vm259_vm2, %v3123_v44 }
0x17a8   :  { %4806 = vmatpush3.xpose.msk.msra.mxu1 %vm259_vm2, %v3203_v47  ;;  %4807 = vmatprep.mubr.msk.f32.mxu1 %vm5130_vm1, %v5129_v41 }
0x17a9   :  { %4815 = vmatprep.subr.mxu1 %v5129_v41 }
0x17ab   :  { %4808 = vmatmul.mubr.msk.f32.vlgmr.msra.gmra.mrb[52].mxu1 %vm259_vm2, %v3201_v49 }
0x17ac   :  { %4817 = vmatprep.mubr.msk.f32.mxu1 %vm5130_vm1, %v5129_v41 }
0x17ca   :  { %v2788_v51 = vpop.xlane.xlu1 %2787 }
0x17cb   :  { %v2792_v54 = vsub.f32 %v2704_v25, %v2788_v51 }
0x17cd   :  { %v2794_v55 = vmul.f32 1.442695, %v2792_v54 }
0x17cf   :  { %5101 = vpow2.f32 %v2794_v55 }
0x17d9   :  { %v5102_v56 = vpop.eup %5101 }
0x17da   :  { %v2798_v58 = vsel %vm259_vm2, %v5102_v56, 0.0 }
0x17db   :  { %2799 = vadd.xlane.f32.xlu0 %v2798_v58 }
0x17f1   :  { %2808 = vrot.lane.b32.xlu0 %v5623_v57, %s5135_s17 }
0x17f5   :  { %3376 = vrot.lane.b32.xlu0 %v5621_v45, %s5138_s24 }
0x17f9   :  { %3537 = vrot.lane.b32.xlu0 %v5623_v57, %s5922_s5 }
0x17fd   :  { %3615 = vrot.lane.b32.xlu0 %v5621_v45, %s5922_s5 }
0x1801   :  { %3535 = vrot.lane.b32.xlu0 %v5631_v59, %s5923_s28 }
0x1868   :  { %v2800_v62 = vpop.xlane.xlu0 %2799 }
0x1869   :  { %5103 = vrcp.f32 %v2800_v62 }
0x186c   :  { %v2809_v0 = vpop.permute.xlu0 %2808 }
0x186d   :  { %4781 = vmatpush3.msra.mxu0 %v2809_v0 }
0x186e   :  { %4790 = vmatprep.subr.mxu0 %v4310_v10 }
0x1870   :  { %v3377_v46 = vpop.permute.xlu0 %3376 }
0x1871   :  { %4816 = vmatpush3.msra.mxu1 %v3377_v46 }
0x1872   :  { %4825 = vmatprep.subr.mxu1 %v5129_v41 }
0x1873   :  { %v5104_v1 = vpop.eup %5103 }
0x1874   :  { %v2806_v2 = vmul.f32 %v5104_v1, %v5102_v56  ;;  %v3538_v22 = vpop.permute.xlu0 %3537  ;;  %v4312_v1 = vld [vmem:[%s5902_s6 + $0x38] sm:$0xff] }
0x1876   :  { %4783 = vmatmul.mubr.msk.f32.vlgmr.msra.gmra.mrb[10].mxu0 %vm259_vm2, %v2806_v2  ;;  %v2956_v3 = vpop.f32.mrb[48].mxu1 }
0x1877   :  { %v4789_v4 = vpop.f32.mrb[49].mxu1  ;;  %4791 = vmatpush3.msra.mxu0 %v4310_v10 }
0x1878   :  { %4795 = vmatprep.subr.mxu0 %v4309_v11  ;;  %v3616_v25 = vpop.permute.xlu0 %3615 }
0x187a   :  { %v3196_v5 = vpop.f32.mrb[50].mxu1 }
0x187b   :  { %v4804_v6 = vpop.f32.mrb[51].mxu1  ;;  %v3278_v7 = vsel %vm259_vm2, %v3196_v5, -inf }
0x187c   :  { %3279 = vmax.xlane.f32.xlu1 %v3278_v7  ;;  %v3536_v27 = vpop.permute.xlu0 %3535 }
0x187e   :  { %v3274_v59 = vpop.f32.mrb[52].mxu1 }
0x187f   :  { %v4809_v8 = vpop.f32.mrb[53].mxu1  ;;  %v3281_v9 = vsel %vm259_vm2, %v3274_v59, -inf }
0x1880   :  { %3282 = vmax.xlane.f32.xlu1 %v3281_v9 }
0x1909   :  { %v3280_v12 = vpop.xlane.xlu1 %3279 }
0x190a   :  { %v3284_v13 = vsub.f32 %v3196_v5, %v3280_v12 }
0x190c   :  { %v3286_v14 = vmul.f32 1.442695, %v3284_v13 }
0x190d   :  { %v3283_v50 = vpop.xlane.xlu1 %3282 }
0x190e   :  { %5105 = vpow2.f32 %v3286_v14  ;;  %v3285_v60 = vsub.f32 %v3274_v59, %v3283_v50  ;;  %v4346_v59 = vld [vmem:[%s5903_s7 + $0x1] ss:$0 sm:$0xff] }
0x1910   :  { %v3288_v15 = vmul.f32 1.442695, %v3285_v60 }
0x1912   :  { %5107 = vpow2.f32 %v3288_v15 }
0x1918   :  { %v5106_v61 = vpop.eup %5105 }
0x1919   :  { %v3290_v39 = vsel %vm259_vm2, %v5106_v61, 0.0 }
0x191a   :  { %3291 = vadd.xlane.f32.xlu1 %v3290_v39 }
0x191c   :  { %v5108_v40 = vpop.eup %5107 }
0x191d   :  { %v3293_v16 = vsel %vm259_vm2, %v5108_v40, 0.0 }
0x191e   :  { %3294 = vadd.xlane.f32.xlu1 %v3293_v16 }
0x192f   :  { %3300 = vrot.lane.b32.xlu1 %v5623_v57, %s5138_s24  ;;  %s5924_s24 = smov 40  }
0x1933   :  { %3613 = vrot.lane.b32.xlu1 %v5640_v63, %s5923_s28 }
0x1949   :  { %v2880_v17 = vpop.f32.mrb[10].mxu0 }
0x194a   :  { %v4784_v18 = vpop.f32.mrb[11].mxu0  ;;  %4792 = vmatprep.mubr.msk.f32.mxu0 %vm259_vm2, %v2880_v17 }
0x194b   :  { %4793 = vmatmul.mubr.msk.f32.vlgmr.msra.gmra.mrb[12].mxu0 %vm259_vm2, %v2956_v3 }
0x194c   :  { %4797 = vmatprep.mubr.msk.f32.mxu0 %vm259_vm2, %v5683_v21  ;;  %4796 = vmatpush3.msra.mxu0 %v4309_v11 }
0x194d   :  { %4810 = vmatprep.subr.mxu0 %v5129_v41 }
0x1953   :  { %4798 = vmatmul.mubr.msk.f32.vlgmr.msra.gmra.mrb[12].mxu0 %vm259_vm2, %v5685_v23 }
0x1954   :  { %4812 = vmatprep.mubr.msk.f32.mxu0 %vm5130_vm1, %v5129_v41 }
0x19a7   :  { %v3292_v19 = vpop.xlane.xlu1 %3291 }
0x19a8   :  { %5109 = vrcp.f32 %v3292_v19  ;;  %v4351_v19 = vld [vmem:[%s5904_s8 + $0x20] sm:$0xff] }
0x19ab   :  { %v3295_v63 = vpop.xlane.xlu1 %3294 }
0x19ac   :  { %5111 = vrcp.f32 %v3295_v63  ;;  %v4352_v63 = vld [vmem:[%s5904_s8 + $0x28] sm:$0xff] }
0x19af   :  { %v3301_v48 = vpop.permute.xlu1 %3300 }
0x19b0   :  { %4811 = vmatpush3.msra.mxu0 %v3301_v48  ;;  %v4353_v48 = vld [vmem:[%s5904_s8 + $0x30] sm:$0xff] }
0x19b1   :  { %4820 = vmatprep.subr.mxu0 %v4311_v20 }
0x19b2   :  { %v5110_v21 = vpop.eup %5109 }
0x19b3   :  { %v3298_v24 = vmul.f32 %v5110_v21, %v5106_v61  ;;  %v3614_v32 = vpop.permute.xlu1 %3613 }
0x19b5   :  { %4813 = vmatmul.mubr.msk.f32.vlgmr.msra.gmra.mrb[14].mxu0 %vm259_vm2, %v3298_v24  ;;  %v4359_v24 = vld [vmem:[%s5905_s10 + $0x80] sm:$0xff] }
0x19b6   :  { %v5112_v23 = vpop.eup %5111  ;;  %4821 = vmatpush3.msra.mxu0 %v4311_v20  ;;  %v4984_v20 = vpack.c.bf16 %v4352_v63, %v4351_v19 }
0x19b7   :  { %v3299_v26 = vmul.f32 %v5112_v23, %v5108_v40  ;;  %4830 = vmatprep.subr.mxu0 %v5129_v41  ;;  %v4360_v23 = vld [vmem:[%s5905_s10 + $0x88] sm:$0xff] }
0x19b9   :  { %4818 = vmatmul.mubr.msk.f32.vlgmr.msra.gmra.mrb[54].mxu1 %vm259_vm2, %v3299_v26  ;;  %v4992_v26 = vpack.c.bf16 %v4360_v23, %v4359_v24 }
0x19ba   :  { %4826 = vmatpush3.xpose.msk.msra.mxu1 %vm259_vm2, %v3538_v22  ;;  %4827 = vmatprep.mubr.msk.f32.mxu1 %vm5130_vm1, %v5129_v41  ;;  %v4354_v22 = vld [vmem:[%s5904_s8 + $0x38] sm:$0xff] }
0x19bb   :  { %4835 = vmatprep.subr.mxu1 %v5129_v41  ;;  %v4988_v21 = vpack.c.bf16 %v4354_v22, %v4353_v48 }
0x19bd   :  { %4828 = vmatmul.mubr.msk.f32.vlgmr.msra.gmra.mrb[56].mxu1 %vm259_vm2, %v3536_v27  ;;  %v4362_v27 = vld [vmem:[%s5905_s10 + $0x98] sm:$0xff] }
0x19be   :  { %4837 = vmatprep.mubr.msk.f32.mxu1 %vm5130_vm1, %v5129_v41 }
0x1a88   :  { %v3372_v28 = vpop.f32.mrb[14].mxu0 }
0x1a89   :  { %v4814_v29 = vpop.f32.mrb[15].mxu0  ;;  %4822 = vmatprep.mubr.msk.f32.mxu0 %vm259_vm2, %v3372_v28 }
0x1a8a   :  { %v4363_v29 = vld [vmem:[%s5905_s10 + $0xa0] sm:$0xff] }
0x1a8c   :  { %v3448_v30 = vpop.f32.mrb[54].mxu1 }
0x1a8d   :  { %v4819_v31 = vpop.f32.mrb[55].mxu1  ;;  %4823 = vmatmul.mubr.msk.f32.vlgmr.msra.gmra.mrb[12].mxu0 %vm259_vm2, %v3448_v30  ;;  %v4364_v30 = vld [vmem:[%s5905_s10 + $0xa8] sm:$0xff] }
0x1a8e   :  { %4831 = vmatpush3.xpose.msk.msra.mxu0 %vm259_vm2, %v3616_v25  ;;  %4832 = vmatprep.mubr.msk.f32.mxu0 %vm5130_vm1, %v5129_v41  ;;  %v4361_v25 = vld [vmem:[%s5905_s10 + $0x90] sm:$0xff]  ;;  %v5000_v31 = vpack.c.bf16 %v4364_v30, %v4363_v29 }
0x1a8f   :  { %4840 = vmatprep.subr.mxu0 %v5129_v41  ;;  %v4996_v28 = vpack.c.bf16 %v4362_v27, %v4361_v25 }
0x1a90   :  { %v3609_v33 = vpop.f32.mrb[56].mxu1 }
0x1a91   :  { %v4829_v34 = vpop.f32.mrb[57].mxu1  ;;  %4833 = vmatmul.mubr.msk.f32.vlgmr.msra.gmra.mrb[16].mxu0 %vm259_vm2, %v3614_v32  ;;  %v3691_v35 = vsel %vm259_vm2, %v3609_v33, -inf  ;;  %v4365_v32 = vld [vmem:[%s5905_s10 + $0xb0] sm:$0xff] }
0x1a92   :  { %3692 = vmax.xlane.f32.xlu0 %v3691_v35  ;;  %4842 = vmatprep.mubr.msk.f32.mxu0 %vm5130_vm1, %v5129_v41  ;;  %v4367_v35 = vld [vmem:[%s5905_s10 + $0xc0] sm:$0xff] }
0x1b1f   :  { %v3693_v36 = vpop.xlane.xlu0 %3692 }
0x1b20   :  { %v3697_v37 = vsub.f32 %v3609_v33, %v3693_v36  ;;  %v4366_v33 = vld [vmem:[%s5905_s10 + $0xb8] sm:$0xff]  ;;  %v4368_v36 = vld [vmem:[%s5905_s10 + $0xc8] sm:$0xff] }
0x1b21   :  { %v5004_v34 = vpack.c.bf16 %v4366_v33, %v4365_v32  ;;  %v4379_v32 = vld [vmem:[%s5910_s14 + $0x1] ss:$0 sm:$0xff] }
0x1b22   :  { %v3699_v38 = vmul.f32 1.442695, %v3697_v37  ;;  %v5008_v37 = vpack.c.bf16 %v4368_v36, %v4367_v35  ;;  %v4380_v35 = vld [vmem:[%s5911_s15 + $0x1] ss:$0 sm:$0xff] }
0x1b24   :  { %5113 = vpow2.f32 %v3699_v38  ;;  %v4369_v38 = vld [vmem:[%s5905_s10 + $0xd0] sm:$0xff] }
0x1b2e   :  { %v5114_v42 = vpop.eup %5113 }
0x1b2f   :  { %v3703_v43 = vsel %vm259_vm2, %v5114_v42, 0.0 }
0x1b30   :  { %3704 = vadd.xlane.f32.xlu0 %v3703_v43 }
0x1b64   :  { %v3687_v44 = vpop.f32.mrb[16].mxu0 }
0x1b65   :  { %v4834_v47 = vpop.f32.mrb[17].mxu0  ;;  %v3694_v49 = vsel %vm259_vm2, %v3687_v44, -inf }
0x1b66   :  { %3695 = vmax.xlane.f32.xlu1 %v3694_v49  ;;  %v4372_v47 = vld [vmem:[%s5905_s10 + $0xe8] sm:$0xff] }
0x1b77   :  { %3713 = vrot.lane.b32.xlu1 %v5623_v57, %s5924_s24 }
0x1bbd   :  { %v3705_v51 = vpop.xlane.xlu0 %3704 }
0x1bbe   :  { %5115 = vrcp.f32 %v3705_v51 }
0x1bc8   :  { %v5116_v41 = vpop.eup %5115 }
0x1bc9   :  { %v3711_v58 = vmul.f32 %v5116_v41, %v5114_v42  ;;  %v4370_v42 = vld [vmem:[%s5905_s10 + $0xd8] sm:$0xff] }
0x1bca   :  { %v5012_v43 = vpack.c.bf16 %v4370_v42, %v4369_v38 }
0x1bf3   :  { %v3696_v54 = vpop.xlane.xlu1 %3695 }
0x1bf4   :  { %v3698_v55 = vsub.f32 %v3687_v44, %v3696_v54  ;;  %v4371_v44 = vld [vmem:[%s5905_s10 + $0xe0] sm:$0xff] }
0x1bf5   :  { %v5016_v49 = vpack.c.bf16 %v4372_v47, %v4371_v44 }
0x1bf6   :  { %v3701_v56 = vmul.f32 1.442695, %v3698_v55 }
0x1bf7   :  { %v3714_v62 = vpop.permute.xlu1 %3713 }
0x1bf8   :  { %5117 = vpow2.f32 %v3701_v56  ;;  %4836 = vmatpush3.msra.mxu1 %v3714_v62 }
0x1bf9   :  { %4838 = vmatmul.mubr.msk.f32.vlgmr.msra.gmra.mrb[58].mxu1 %vm259_vm2, %v3711_v58  ;;  %4985 = vmatprep.subr.bf16.mxu1 %v4984_v20 }
0x1bfa   :  { %4987 = vmatpush3.bf16.msra.mxu1 %v4984_v20 }
0x1bfb   :  { %4989 = vmatprep.subr.bf16.mxu1 %v4988_v21 }
0x1bfe   :  { %4991 = vmatpush3.bf16.msra.mxu1 %v4988_v21 }
0x1c02   :  { %v5118_v0 = vpop.eup %5117 }
0x1c03   :  { %v3706_v46 = vsel %vm259_vm2, %v5118_v0, 0.0 }
0x1c04   :  { %3707 = vadd.xlane.f32.xlu0 %v3706_v46 }
0x1c1a   :  { %3789 = vrot.lane.b32.xlu0 %v5621_v45, %s5924_s24 }
0x1c91   :  { %v3708_v57 = vpop.xlane.xlu0 %3707 }
0x1c92   :  { %5119 = vrcp.f32 %v3708_v57 }
0x1c95   :  { %v3790_v2 = vpop.permute.xlu0 %3789 }
0x1c96   :  { %4841 = vmatpush3.msra.mxu0 %v3790_v2  ;;  %v4350_v2 = vld [vmem:[%s5907_s13 + $0x1] ss:$0 sm:$0xff] }
0x1c97   :  { %4845 = vmatprep.subr.mxu0 %v4312_v1 }
0x1c9c   :  { %v5120_v3 = vpop.eup %5119 }
0x1c9d   :  { %v3712_v4 = vmul.f32 %v5120_v3, %v5118_v0  ;;  %v4349_v0 = vld [vmem:[%s5906_s12 + $0x1] ss:$0 sm:$0xff] }
0x1c9f   :  { %4843 = vmatmul.mubr.msk.f32.vlgmr.msra.gmra.mrb[18].mxu0 %vm259_vm2, %v3712_v4 }
0x1ca0   :  { %4846 = vmatpush3.msra.mxu0 %v4312_v1 }
0x1ca1   :  { %4993 = vmatprep.subr.bf16.mxu0 %v4992_v26 }
0x1ccc   :  { %v3785_v5 = vpop.f32.mrb[58].mxu1 }
0x1ccd   :  { %v4839_v6 = vpop.f32.mrb[59].mxu1  ;;  %4847 = vmatprep.mubr.msk.f32.mxu0 %vm259_vm2, %v3785_v5 }
0x1d72   :  { %v3861_v7 = vpop.f32.mrb[18].mxu0 }
0x1d73   :  { %v4844_v45 = vpop.f32.mrb[19].mxu0  ;;  %4848 = vmatmul.mubr.msk.f32.vlgmr.msra.gmra.mrb[12].mxu0 %vm259_vm2, %v3861_v7  ;;  %v4373_v7 = vld [vmem:[%s5905_s10 + $0xf0] sm:$0xff] }
0x1d74   :  { %4995 = vmatpush3.bf16.msra.mxu0 %v4992_v26  ;;  %v4374_v45 = vld [vmem:[%s5905_s10 + $0xf8] sm:$0xff] }
0x1d75   :  { %4997 = vmatprep.subr.bf16.mxu0 %v4996_v28 }
0x1d78   :  { %4999 = vmatpush3.bf16.msra.mxu0 %v4996_v28 }
0x1d79   :  { %5001 = vmatprep.subr.bf16.mxu0 %v5000_v31 }
0x1d7c   :  { %5003 = vmatpush3.bf16.msra.mxu0 %v5000_v31 }
0x1d7d   :  { %5005 = vmatprep.subr.bf16.mxu0 %v5004_v34 }
0x1d80   :  { %5007 = vmatpush3.bf16.msra.mxu0 %v5004_v34 }
0x1d81   :  { %5009 = vmatprep.subr.bf16.mxu0 %v5008_v37 }
0x1d84   :  { %5011 = vmatpush3.bf16.msra.mxu0 %v5008_v37 }
0x1d85   :  { %5013 = vmatprep.subr.bf16.mxu0 %v5012_v43 }
0x1d88   :  { %5015 = vmatpush3.bf16.msra.mxu0 %v5012_v43 }
0x1d89   :  { %5017 = vmatprep.subr.bf16.mxu0 %v5016_v49 }
0x1d8c   :  { %5019 = vmatpush3.bf16.msra.mxu0 %v5016_v49 }
0x1e46   :  { %v4849_v8 = vpop.f32.mrb[12].mxu0 }
0x1e47   :  { %v3957_v9 = vadd.f32 %v4849_v8, %v4346_v59  ;;  %v3937_v10 = vpop.f32.mrb[13].mxu0  ;;  %v4356_v8 = vld [vmem:[%s5908_s9 + $0x1] ss:$0 sm:$0xff] }
0x1e48   :  { %v3956_v11 = vadd.f32 %v4346_v59, %v3937_v10  ;;  %v5020_v59 = vpack.c.bf16 %v4374_v45, %v4373_v7 }
0x1e49   :  { %v3959_v12 = vadd.f32 %v3957_v9, %v5610_v53 }
0x1e4a   :  { %v3958_v13 = vadd.f32 %v3956_v11, %v5608_v52  ;;  %5021 = vmatprep.subr.bf16.mxu0 %v5020_v59 }
0x1e4b   :  { %v3967_v14 = vsel %vm168_vm0, %v3959_v12, 0.0  ;;  %5023 = vmatpush3.bf16.msra.mxu0 %v5020_v59 }
0x1e4c   :  { %3968 = vadd.xlane.f32.xlu0 %v3967_v14  ;;  %v3964_v50 = vsel %vm168_vm0, %v3958_v13, 0.0 }
0x1e4d   :  { %3965 = vadd.xlane.f32.xlu1 %v3964_v50  ;;  %v4376_v50 = vld [vmem:[%s5909_s11 + $0x1] ss:$0 sm:$0xff] }
0x1ed9   :  { %v3969_v60 = vpop.xlane.xlu0 %3968 }
0x1eda   :  { %v3971_v15 = vmul.f32 0.03125, %v3969_v60  ;;  %v3966_v61 = vpop.xlane.xlu1 %3965 }
0x1edb   :  { %v3970_v39 = vmul.f32 0.03125, %v3966_v61 }
0x1edc   :  { %v5792_v40 = vsub.f32 %v3959_v12, %v3971_v15 }
0x1edd   :  { %v5794_v16 = vsub.f32 %v3958_v13, %v3970_v39 }
0x1ede   :  { %v3975_v17 = vmul.f32 %v5792_v40, %v5792_v40 }
0x1edf   :  { %v3974_v52 = vmul.f32 %v5794_v16, %v5794_v16 }
0x1ee0   :  { %v3979_v53 = vsel %vm168_vm0, %v3975_v17, 0.0 }
0x1ee1   :  { %3980 = vadd.xlane.f32.xlu0 %v3979_v53  ;;  %v3976_v18 = vsel %vm168_vm0, %v3974_v52, 0.0 }
0x1ee2   :  { %3977 = vadd.xlane.f32.xlu1 %v3976_v18 }
0x1f6e   :  { %v3981_v51 = vpop.xlane.xlu0 %3980 }
0x1f6f   :  { %v3983_v54 = vmul.f32 0.03125, %v3981_v51  ;;  %v3978_v41 = vpop.xlane.xlu1 %3977 }
0x1f70   :  { %v3982_v55 = vmul.f32 0.03125, %v3978_v41 }
0x1f71   :  { %v3985_v56 = vadd.f32 1e-05, %v3983_v54 }
0x1f72   :  { %v3984_v58 = vadd.f32 1e-05, %v3982_v55 }
0x1f73   :  { %5121 = vrsqrt.f32 %v3985_v56 }
0x1f74   :  { %5123 = vrsqrt.f32 %v3984_v58 }
0x1f7d   :  { %v5122_v62 = vpop.eup %5121 }
0x1f7e   :  { %v5124_v46 = vpop.eup %5123  ;;  %v3989_v57 = vmul.f32 %v5122_v62, %v5792_v40 }
0x1f7f   :  { %v3988_v1 = vmul.f32 %v5124_v46, %v5794_v16 }
0x1f80   :  { %v3997_v3 = vmul.f32 %v4349_v0, %v3989_v57 }
0x1f81   :  { %v3996_v4 = vmul.f32 %v4349_v0, %v3988_v1 }
0x1f82   :  { %v4005_v6 = vadd.f32 %v4350_v2, %v3997_v3 }
0x1f83   :  { %v4004_v5 = vadd.f32 %v4350_v2, %v3996_v4 }
0x1f85   :  { %4858 = vmatprep.mubr.msk.f32.mxu1 %vm168_vm0, %v4004_v5 }
0x1f86   :  { %4859 = vmatmul.mubr.msk.f32.vlgmr.msra.gmra.mrb[60].mxu1 %vm168_vm0, %v4005_v6 }
0x2059   :  { %v4860_v9 = vpop.f32.mrb[60].mxu1 }
0x205a   :  { %v4097_v10 = vadd.f32 %v4860_v9, %v4356_v8  ;;  %v4091_v11 = vpop.f32.mrb[61].mxu1 }
0x205b   :  { %v4092_v12 = vadd.f32 %v4356_v8, %v4091_v11 }
0x205c   :  { %v4101_v14 = vmax.f32 %v4097_v10, 0.0 }
0x205d   :  { %v4100_v13 = vmax.f32 %v4092_v12, 0.0 }
0x205f   :  { %4893 = vmatprep.mubr.f32.mxu0 %v4100_v13 }
0x2060   :  { %4894 = vmatmul.mubr.f32.vlgmr.msra.gmra.mrb[20].mxu0 %v4101_v14 }
0x2133   :  { %v4895_v60 = vpop.f32.mrb[20].mxu0 }
0x2134   :  { %v4199_v15 = vadd.f32 %v4895_v60, %v4376_v50  ;;  %v4193_v61 = vpop.f32.mrb[21].mxu0 }
0x2135   :  { %v4194_v39 = vadd.f32 %v4376_v50, %v4193_v61 }
0x2136   :  { %v4203_v40 = vadd.f32 %v4199_v15, %v4005_v6 }
0x2137   :  { %v4202_v16 = vadd.f32 %v4194_v39, %v4004_v5 }
0x2138   :  { %v4211_v17 = vsel %vm168_vm0, %v4203_v40, 0.0 }
0x2139   :  { %4212 = vadd.xlane.f32.xlu0 %v4211_v17  ;;  %v4208_v52 = vsel %vm168_vm0, %v4202_v16, 0.0 }
0x213a   :  { %4209 = vadd.xlane.f32.xlu1 %v4208_v52 }
0x21c6   :  { %v4213_v53 = vpop.xlane.xlu0 %4212 }
0x21c7   :  { %v4215_v18 = vmul.f32 0.03125, %v4213_v53  ;;  %v4210_v19 = vpop.xlane.xlu1 %4209 }
0x21c8   :  { %v4214_v63 = vmul.f32 0.03125, %v4210_v19 }
0x21c9   :  { %v4217_v20 = vsub.f32 %v4203_v40, %v4215_v18 }
0x21ca   :  { %v4216_v48 = vsub.f32 %v4202_v16, %v4214_v63 }
0x21cb   :  { %v4219_v22 = vmul.f32 %v4217_v20, %v4217_v20 }
0x21cc   :  { %v4218_v21 = vmul.f32 %v4216_v48, %v4216_v48 }
0x21cd   :  { %v4223_v24 = vsel %vm168_vm0, %v4219_v22, 0.0 }
0x21ce   :  { %4224 = vadd.xlane.f32.xlu0 %v4223_v24  ;;  %v4220_v23 = vsel %vm168_vm0, %v4218_v21, 0.0 }
0x21cf   :  { %4221 = vadd.xlane.f32.xlu1 %v4220_v23 }
0x225b   :  { %v4225_v25 = vpop.xlane.xlu0 %4224 }
0x225c   :  { %v4227_v26 = vmul.f32 0.03125, %v4225_v25  ;;  %v4222_v27 = vpop.xlane.xlu1 %4221 }
0x225d   :  { %v4226_v28 = vmul.f32 0.03125, %v4222_v27 }
0x225e   :  { %v4229_v29 = vadd.f32 1e-05, %v4227_v26 }
0x225f   :  { %v4228_v30 = vadd.f32 1e-05, %v4226_v28 }
0x2260   :  { %5125 = vrsqrt.f32 %v4229_v29 }
0x2261   :  { %5127 = vrsqrt.f32 %v4228_v30 }
0x226a   :  { %v5126_v31 = vpop.eup %5125 }
0x226b   :  { %v5128_v33 = vpop.eup %5127  ;;  %v4233_v34 = vmul.f32 %v5126_v31, %v4217_v20 }
0x226c   :  { %v4232_v36 = vmul.f32 %v5128_v33, %v4216_v48 }
0x226d   :  { %v4241_v37 = vmul.f32 %v4379_v32, %v4233_v34 }
0x226e   :  { %v4240_v38 = vmul.f32 %v4379_v32, %v4232_v36 }
0x226f   :  { %v4249_v42 = vadd.f32 %v4380_v35, %v4241_v37 }
0x2270   :  { %v4248_v43 = vadd.f32 %v4380_v35, %v4240_v38 }
0x2271   :  { %4251 = vst.msk [vmem:[%s5912_s16 + $0x8] sm:$0xff] %vm168_vm0, %v4249_v42 }
0x2272   :  { %4250 = vst.msk [vmem:[%s5912_s16] sm:$0xff] %vm168_vm0, %v4248_v43 }

</bundles_post_ra>
